<compile_context>
chip_gen: v6e
topology: v6e:2x2x1
jax: 0.10.0
libtpu: 0.0.40
codegen_flags: <defaults>
</compile_context>

<pallas_src>
import functools

import jax
import jax.numpy as jnp
from jax import lax
from jax.experimental import pallas as pl
from jax.experimental.pallas import tpu as pltpu


# ----------------------------- Pallas kernel ------------------------------- #
def bottleneck_kernel(x_ref, wa_ref, b1_ref, w2_ref, b2_ref, w3_ref, b3_ref,
                      *rest, mode, H, W, stride, TH, LEFTPAD):
    # mode == "fused":    wa = concat(w1, wd) (Cin, P+Cout), rest = (bd, out, hp)
    # mode == "strided":  wa = w1,                            rest = (wd, bd, out, hp)
    # mode == "identity": wa = w1,                            rest = (out, hp)
    if mode == "fused":
        bd_ref, out_ref, hp_ref = rest
    elif mode == "strided":
        wd_ref, bd_ref, out_ref, hp_ref = rest
    else:
        out_ref, hp_ref = rest

    Cin = x_ref.shape[-1]
    P = w2_ref.shape[-1]
    Cout = w3_ref.shape[-1]
    cd = w2_ref.dtype                          # MXU compute dtype
    s = stride
    Wout = (W - 1) // s + 1
    NI = (TH - 1) * s + 1                      # interior input rows of this tile
    HP = NI + 2                                # padded rows held in scratch

    t = pl.program_id(1)
    r0 = t * (TH * s)                          # first interior input row (global)

    # --- conv1 (1x1) + bn1 + relu, fused with the 1x1 downsample when s==1 ----
    xi = x_ref[0, pl.ds(r0, NI), :, :]                         # (NI, W, Cin)
    y = jnp.dot(xi.reshape(NI * W, Cin).astype(cd), wa_ref[...],
                preferred_element_type=jnp.float32)
    h1 = jnp.maximum(y[:, :P] + b1_ref[...], 0.0)              # (NI*W, P) f32
    if mode == "fused":
        res = y[:, P:] + bd_ref[...]                           # (TH*W, Cout) f32

    # Halo rows for the 3x3 conv: conv1 of the row above / below the tile,
    # zeroed (masked) when that row lies outside the image.
    top_g = r0 - 1
    bot_g = r0 + NI
    xt = x_ref[0, pl.ds(jnp.maximum(top_g, 0), 1), :, :].reshape(W, Cin)
    xb = x_ref[0, pl.ds(jnp.minimum(bot_g, H - 1), 1), :, :].reshape(W, Cin)
    yh = jnp.dot(jnp.concatenate([xt, xb], axis=0).astype(cd), wa_ref[...],
                 preferred_element_type=jnp.float32)
    hh = jnp.maximum(yh[:, :P] + b1_ref[...], 0.0)             # (2W, P) f32
    top_ok = jnp.where(top_g >= 0, 1.0, 0.0)
    bot_ok = jnp.where(bot_g <= H - 1, 1.0, 0.0)

    # --- padded activation scratch (compute dtype, sublane-aligned interior) --
    # Invariant: the 3x3 slices below only ever read hp columns in
    # [LEFTPAD-1, LEFTPAD+W]; those two border columns are zeroed every step
    # and columns outside that range may hold stale data.
    zcol = jnp.zeros((HP, 1, P), cd)
    hp_ref[:, LEFTPAD - 1:LEFTPAD, :] = zcol                   # left zero pad
    hp_ref[:, LEFTPAD + W:LEFTPAD + W + 1, :] = zcol           # right zero pad
    hp_ref[1:NI + 1, LEFTPAD:LEFTPAD + W, :] = h1.reshape(NI, W, P).astype(cd)
    hp_ref[0:1, LEFTPAD:LEFTPAD + W, :] = (
        (hh[:W, :] * top_ok).reshape(1, W, P).astype(cd))
    hp_ref[NI + 1:NI + 2, LEFTPAD:LEFTPAD + W, :] = (
        (hh[W:, :] * bot_ok).reshape(1, W, P).astype(cd))

    # --- conv2 (3x3, stride, pad=1) as ONE im2col matmul, contraction 9*P -----
    cols = []
    if s == 1:
        hp = hp_ref[...]                                       # (HP, Wp, P) cd
        for kh in range(3):
            for kw in range(3):
                c0 = LEFTPAD - 1 + kw
                cols.append(lax.slice(hp, (kh, c0, 0),
                                      (kh + TH, c0 + Wout, P)).reshape(TH * Wout, P))
    else:
        # Two sublane-strided phase reads replace 9 doubly-strided slices.
        A = hp_ref[:, pl.ds(LEFTPAD - 1, Wout + 1, 2), :]      # padded cols 2c
        B = hp_ref[:, pl.ds(LEFTPAD, Wout, 2), :]              # padded cols 2c+1
        for kh in range(3):
            for kw in range(3):
                src, c0 = (B, 0) if kw == 1 else (A, kw // 2)
                cols.append(lax.slice(src, (kh, c0, 0),
                                      (kh + NI, c0 + Wout, P),
                                      (s, 1, 1)).reshape(TH * Wout, P))
    patches = jnp.concatenate(cols, axis=-1)                   # (TH*Wout, 9P) cd
    h2 = jnp.maximum(jnp.dot(patches, w2_ref[...],
                             preferred_element_type=jnp.float32) + b2_ref[...], 0.0)

    # --- conv3 (1x1) + bn3 -----------------------------------------------------
    h3 = jnp.dot(h2.astype(cd), w3_ref[...],
                 preferred_element_type=jnp.float32) + b3_ref[...]

    # --- shortcut ----------------------------------------------------------------
    if mode == "strided":
        # Subsample rows (outer dim) first, then columns; no dtype round trip.
        xr = lax.slice(xi, (0, 0, 0), (NI, W, Cin), (s, 1, 1))
        xr = lax.slice(xr, (0, 0, 0), (TH, (Wout - 1) * s + 1, Cin), (1, s, 1))
        res = jnp.dot(xr.reshape(TH * Wout, Cin).astype(cd), wd_ref[...],
                      preferred_element_type=jnp.float32) + bd_ref[...]
    elif mode == "identity":
        # Identity residual taken from x in its original dtype -> exact in f32.
        res = xi.reshape(TH * W, Cin).astype(jnp.float32)

    # --- residual add + relu (f32), single cast at the store ---------------------
    out = jnp.maximum(h3 + res, 0.0)
    out_ref[0] = out.reshape(TH, Wout, Cout).astype(out_ref.dtype)


# ------------------------------ parameter prep ------------------------------ #
def _fold_bn(gamma, beta, mean, var, eps=1e-5):
    scale = (gamma / jnp.sqrt(var + eps)).astype(jnp.float32)
    bias = (beta - mean * scale).astype(jnp.float32)
    return scale, bias


def fold_bottleneck_params(params, *, stride=1, compute_dtype=jnp.bfloat16):
    """One-time prep: fold BN into the conv weights, reshape for the kernel and
    cast to the MXU compute dtype.  Reuse the result across calls."""
    w1, bn1, w2, bn2, w3, bn3, wd, bnd = params
    Cin, P = w1.shape
    Cout = w3.shape[1]
    has_ds = (stride != 1) or (Cin != Cout)

    s1, b1 = _fold_bn(*bn1)
    s2, b2 = _fold_bn(*bn2)
    s3, b3 = _fold_bn(*bn3)
    w1f = (w1.astype(jnp.float32) * s1[None, :]).astype(compute_dtype)
    w2f = (w2.astype(jnp.float32) * s2[None, None, None, :]).reshape(9 * P, P)
    w2f = w2f.astype(compute_dtype)            # rows ordered (kh, kw, cin)
    w3f = (w3.astype(jnp.float32) * s3[None, :]).astype(compute_dtype)

    folded = dict(P=P, Cin=Cin, Cout=Cout, stride=stride,
                  compute_dtype=compute_dtype,
                  b1=b1.reshape(1, P), b2=b2.reshape(1, P), b3=b3.reshape(1, Cout),
                  w2=w2f, w3=w3f)
    if has_ds:
        sd, bd = _fold_bn(*bnd)
        wdf = (wd.astype(jnp.float32) * sd[None, :]).astype(compute_dtype)
        folded["bd"] = bd.reshape(1, Cout)
        if stride == 1:
            folded["mode"] = "fused"
            folded["wa"] = jnp.concatenate([w1f, wdf], axis=1)  # (Cin, P+Cout)
        else:
            folded["mode"] = "strided"
            folded["wa"] = w1f
            folded["wd"] = wdf
    else:
        folded["mode"] = "identity"
        folded["wa"] = w1f
    return folded


def _choose_row_tile(Hout, Wout, P, Cout, cd):
    """Largest divisor of Hout whose per-tile transients stay ~<= 4 MiB."""
    itm = jnp.dtype(cd).itemsize
    budget = 4 * 1024 * 1024

    def tile_bytes(th):
        px = th * Wout
        return px * 9 * P * itm + px * (2 * P + 3 * Cout) * 4

    for cand in range(Hout, 0, -1):
        if Hout % cand == 0 and tile_bytes(cand) <= budget:
            return cand
    return 1


# ------------------------------ forward (NHWC) ------------------------------ #
def bottleneck_forward_nhwc(x_nhwc, folded, *, row_tile=None, out_dtype=None):
    N, H, W, Cin = x_nhwc.shape
    stride = folded["stride"]
    mode = folded["mode"]
    P, Cout = folded["P"], folded["Cout"]
    cd = folded["compute_dtype"]
    assert Cin == folded["Cin"]

    Hout = (H - 1) // stride + 1
    Wout = (W - 1) // stride + 1
    out_dtype = cd if out_dtype is None else out_dtype

    TH = _choose_row_tile(Hout, Wout, P, Cout, cd) if row_tile is None else row_tile
    assert Hout % TH == 0, (Hout, TH)
    R = Hout // TH
    NI = (TH - 1) * stride + 1
    HP = NI + 2
    LEFTPAD = 8                                   # sublane-aligned interior store
    sub = 16 if jnp.dtype(cd).itemsize == 2 else 8
    Wp = ((LEFTPAD + W + 1 + sub - 1) // sub) * sub

    def const_spec(a):
        shp = a.shape
        return pl.BlockSpec(shp, lambda n, t: (0,) * len(shp))

    operands = [x_nhwc, folded["wa"], folded["b1"], folded["w2"], folded["b2"],
                folded["w3"], folded["b3"]]
    in_specs = [pl.BlockSpec((1, H, W, Cin), lambda n, t: (n, 0, 0, 0))]
    in_specs += [const_spec(a) for a in operands[1:]]
    if mode == "fused":
        operands.append(folded["bd"])
        in_specs.append(const_spec(folded["bd"]))
    elif mode == "strided":
        operands += [folded["wd"], folded["bd"]]
        in_specs += [const_spec(folded["wd"]), const_spec(folded["bd"])]

    # VMEM budget derived from the tile working set, capped at 48 MiB (v7x-safe).
    itm = jnp.dtype(cd).itemsize
    w_bytes = sum(int(a.size) * a.dtype.itemsize for a in operands[1:])
    x_bytes = H * W * Cin * x_nhwc.dtype.itemsize
    o_bytes = TH * Wout * Cout * jnp.dtype(out_dtype).itemsize
    scratch_bytes = HP * Wp * P * itm
    px = TH * Wout
    trans_bytes = px * 9 * P * itm + px * (2 * P + 3 * Cout) * 4 + NI * W * P * 4
    est = 2 * (x_bytes + o_bytes + w_bytes) + scratch_bytes + trans_bytes
    vmem_limit = int(min(max(2 * est, 32 * 1024 * 1024), 48 * 1024 * 1024))

    flops_px = Cin * P + 9 * P * P + P * Cout + (Cin * Cout if mode != "identity" else 0)
    cost = pl.CostEstimate(
        flops=int(2 * N * Hout * Wout * flops_px),
        transcendentals=0,
        bytes_accessed=int(N * (x_bytes + Hout * Wout * Cout
                                * jnp.dtype(out_dtype).itemsize) + w_bytes))

    kernel = functools.partial(bottleneck_kernel, mode=mode, H=H, W=W,
                               stride=stride, TH=TH, LEFTPAD=LEFTPAD)
    return pl.pallas_call(
        kernel,
        out_shape=jax.ShapeDtypeStruct((N, Hout, Wout, Cout), out_dtype),
        grid=(N, R),
        in_specs=in_specs,
        out_specs=pl.BlockSpec((1, TH, Wout, Cout), lambda n, t: (n, t, 0, 0)),
        scratch_shapes=[pltpu.VMEM((HP, Wp, P), cd)],
        compiler_params=pltpu.CompilerParams(
            dimension_semantics=("parallel", "parallel"),
            vmem_limit_bytes=vmem_limit),
        cost_estimate=cost,
    )(*operands)


# ------------------------------ forward (NCHW) ------------------------------ #
def bottleneck_forward(x_nchw, params, *, stride=1, compute_dtype=jnp.bfloat16,
                       out_dtype=None, row_tile=None):
    """Drop-in NCHW convenience wrapper.  For chained blocks, call
    fold_bottleneck_params once and bottleneck_forward_nhwc directly so the BN
    fold / casts / layout transposes stay off the steady-state path."""
    folded = fold_bottleneck_params(params, stride=stride,
                                    compute_dtype=compute_dtype)
    x_nhwc = jnp.transpose(x_nchw, (0, 2, 3, 1))       # dtype kept as provided
    out = bottleneck_forward_nhwc(x_nhwc, folded, row_tile=row_tile,
                                  out_dtype=out_dtype)
    return jnp.transpose(out, (0, 3, 1, 2))


# --------------------------- pure-JAX reference ----------------------------- #
def reference_forward(x_nchw, params, *, stride=1):
    w1, bn1, w2, bn2, w3, bn3, wd, bnd = params
    Cin = x_nchw.shape[1]
    Cout = w3.shape[-1]
    has_downsample = (stride != 1) or (Cin != Cout)
    x = jnp.transpose(x_nchw, (0, 2, 3, 1)).astype(jnp.float32)
    dn = ("NHWC", "HWIO", "NHWC")

    def conv1x1(x, w, s):
        return lax.conv_general_dilated(x, w.reshape(1, 1, *w.shape),
                                        (s, s), "VALID", dimension_numbers=dn)

    def bn(x, p):
        s, b = _fold_bn(*p)
        return x * s.reshape(1, 1, 1, -1) + b.reshape(1, 1, 1, -1)

    h = jax.nn.relu(bn(conv1x1(x, w1, 1), bn1))
    h = lax.conv_general_dilated(h, w2, (stride, stride), ((1, 1), (1, 1)),
                                 dimension_numbers=dn)
    h = jax.nn.relu(bn(h, bn2))
    h = bn(conv1x1(h, w3, 1), bn3)
    d = bn(conv1x1(x, wd, stride), bnd) if has_downsample else x
    out = jax.nn.relu(h + d)
    return jnp.transpose(out, (0, 3, 1, 2))


# --------------------------------- main -------------------------------------- #
if __name__ == "__main__":
    key = jax.random.PRNGKey(0)

    def bn_params(k, c):
        a, b, c_, d = jax.random.split(k, 4)
        gamma = 1.0 + 0.1 * jax.random.normal(a, (c,), jnp.float32)
        beta = 0.1 * jax.random.normal(b, (c,), jnp.float32)
        mean = 0.1 * jax.random.normal(c_, (c,), jnp.float32)
        var = jnp.abs(jax.random.normal(d, (c,), jnp.float32)) + 0.5
        return (gamma, beta, mean, var)

    def make_params(k, cin, planes, stride):
        cout = 4 * planes
        ks = jax.random.split(k, 9)
        w1 = 0.3 * jax.random.normal(ks[0], (cin, planes), jnp.float32)
        w2 = 0.3 * jax.random.normal(ks[1], (3, 3, planes, planes), jnp.float32)
        w3 = 0.3 * jax.random.normal(ks[2], (planes, cout), jnp.float32)
        has_ds = (stride != 1) or (cin != cout)
        wd = 0.3 * jax.random.normal(ks[3], (cin, cout), jnp.float32) if has_ds else None
        bnd = bn_params(ks[7], cout) if has_ds else None
        return (w1, bn_params(ks[4], planes), w2, bn_params(ks[5], planes),
                w3, bn_params(ks[6], cout), wd, bnd)

    # (N, Cin, H, W, planes, stride, row_tile)
    configs = [
        (2, 4, 16, 16, 4, 1, 8),     # fused conv1+downsample, 2 row tiles
        (2, 16, 8, 8, 4, 1, None),   # identity shortcut, single tile
        (2, 16, 16, 16, 4, 1, 4),    # identity shortcut, 4 row tiles
        (2, 4, 16, 16, 4, 2, 4),     # stride-2 downsample, 2 row tiles
        (2, 4, 9, 9, 4, 2, None),    # odd spatial size, stride 2, single tile
    ]

    for idx, (N, Cin, H, W, planes, stride, row_tile) in enumerate(configs):
        kp, kx = jax.random.split(jax.random.fold_in(key, idx))
        params = make_params(kp, Cin, planes, stride)
        x = jax.random.normal(kx, (N, Cin, H, W), jnp.float32)
        ref = reference_forward(x, params, stride=stride)

        # f32 compute path: near-exact match against the reference.
        out32 = jax.block_until_ready(
            bottleneck_forward(x, params, stride=stride,
                               compute_dtype=jnp.float32, row_tile=row_tile))
        assert out32.shape == ref.shape, (out32.shape, ref.shape)
        err32 = float(jnp.max(jnp.abs(out32 - ref)))
        assert jnp.allclose(out32, ref, atol=5e-4, rtol=5e-4), (idx, err32)

        # Default bf16 operands + bf16 output: looser tolerance (bf16 rounding).
        out16 = jax.block_until_ready(
            bottleneck_forward(x, params, stride=stride,
                               compute_dtype=jnp.bfloat16, row_tile=row_tile))
        out16 = out16.astype(jnp.float32)
        err16 = float(jnp.max(jnp.abs(out16 - ref)))
        assert jnp.allclose(out16, ref, atol=1.5e-1, rtol=5e-2), (idx, err16)

    print("KERNEL_OK")
</pallas_src>

<mosaic_0001>
module attributes {stable_mosaic.version = 11 : i64} {
  func.func @bottleneck_kernel(%arg0: i32, %arg1: i32, %arg2: memref<1x16x16x4xf32, #tpu.memory_space<vmem>>, %arg3: memref<4x20xf32, #tpu.memory_space<vmem>>, %arg4: memref<1x4xf32, #tpu.memory_space<vmem>>, %arg5: memref<36x4xf32, #tpu.memory_space<vmem>>, %arg6: memref<1x4xf32, #tpu.memory_space<vmem>>, %arg7: memref<4x16xf32, #tpu.memory_space<vmem>>, %arg8: memref<1x16xf32, #tpu.memory_space<vmem>>, %arg9: memref<1x16xf32, #tpu.memory_space<vmem>>, %arg10: memref<1x8x16x16xf32, #tpu.memory_space<vmem>>, %arg11: memref<10x32x4xf32, #tpu.memory_space<vmem>>) attributes {dimension_semantics = [#tpu.dimension_semantics<parallel>, #tpu.dimension_semantics<parallel>], iteration_bounds = array<i64: 2, 2>, scalar_prefetch = 0 : i64, scratch_operands = 1 : i64, tpu.core_type = #tpu.core_type<tc>, window_params = [{transform_indices = @transform_0, window_bounds = array<i64: 1, 16, 16, 4>}, {pipeline_mode = #tpu.pipeline_mode<synchronous>, transform_indices = @transform_1, window_bounds = array<i64: 4, 20>}, {pipeline_mode = #tpu.pipeline_mode<synchronous>, transform_indices = @transform_2, window_bounds = array<i64: 1, 4>}, {pipeline_mode = #tpu.pipeline_mode<synchronous>, transform_indices = @transform_3, window_bounds = array<i64: 36, 4>}, {pipeline_mode = #tpu.pipeline_mode<synchronous>, transform_indices = @transform_4, window_bounds = array<i64: 1, 4>}, {pipeline_mode = #tpu.pipeline_mode<synchronous>, transform_indices = @transform_5, window_bounds = array<i64: 4, 16>}, {pipeline_mode = #tpu.pipeline_mode<synchronous>, transform_indices = @transform_6, window_bounds = array<i64: 1, 16>}, {pipeline_mode = #tpu.pipeline_mode<synchronous>, transform_indices = @transform_7, window_bounds = array<i64: 1, 16>}, {transform_indices = @transform_8, window_bounds = array<i64: 1, 8, 16, 16>}]} {
    %c8_i32 = arith.constant 8 : i32
    %0 = arith.muli %arg1, %c8_i32 : i32
    %c0 = arith.constant 0 : index
    %1 = arith.index_cast %0 : i32 to index
    %c0_0 = arith.constant 0 : index
    %c0_1 = arith.constant 0 : index
    %2 = vector.load %arg2[%c0, %1, %c0_0, %c0_1] : memref<1x16x16x4xf32, #tpu.memory_space<vmem>>, vector<1x8x16x4xf32>
    %3 = vector.shape_cast %2 : vector<1x8x16x4xf32> to vector<8x16x4xf32>
    %4 = vector.shape_cast %3 : vector<8x16x4xf32> to vector<128x4xf32>
    %c0_2 = arith.constant 0 : index
    %c0_3 = arith.constant 0 : index
    %5 = vector.load %arg3[%c0_2, %c0_3] : memref<4x20xf32, #tpu.memory_space<vmem>>, vector<4x20xf32>
    %cst = arith.constant dense<0.000000e+00> : vector<128x20xf32>
    %6 = tpu.matmul %4, %5, %cst {dimension_numbers = #tpu.dot_dimension_numbers<[1], [0], [0], [1], [0, 0, 1, 1], [], []>} : vector<128x4xf32>, vector<4x20xf32>, vector<128x20xf32> -> vector<128x20xf32>
    %7 = vector.extract_strided_slice %6 {offsets = [0, 0], sizes = [128, 4], strides = [1, 1]} : vector<128x20xf32> to vector<128x4xf32>
    %c0_4 = arith.constant 0 : index
    %c0_5 = arith.constant 0 : index
    %8 = vector.load %arg4[%c0_4, %c0_5] : memref<1x4xf32, #tpu.memory_space<vmem>>, vector<1x4xf32>
    %9 = vector.broadcast %8 : vector<1x4xf32> to vector<128x4xf32>
    %10 = arith.addf %7, %9 : vector<128x4xf32>
    %cst_6 = arith.constant 0.000000e+00 : f32
    %11 = vector.broadcast %cst_6 : f32 to vector<128x4xf32>
    %12 = arith.maximumf %10, %11 : vector<128x4xf32>
    %13 = vector.extract_strided_slice %6 {offsets = [0, 4], sizes = [128, 16], strides = [1, 1]} : vector<128x20xf32> to vector<128x16xf32>
    %c0_7 = arith.constant 0 : index
    %c0_8 = arith.constant 0 : index
    %14 = vector.load %arg9[%c0_7, %c0_8] : memref<1x16xf32, #tpu.memory_space<vmem>>, vector<1x16xf32>
    %15 = vector.broadcast %14 : vector<1x16xf32> to vector<128x16xf32>
    %16 = arith.addf %13, %15 : vector<128x16xf32>
    %c1_i32 = arith.constant 1 : i32
    %17 = arith.subi %0, %c1_i32 : i32
    %c8_i32_9 = arith.constant 8 : i32
    %18 = arith.addi %0, %c8_i32_9 : i32
    %c0_i32 = arith.constant 0 : i32
    %19 = arith.maxsi %17, %c0_i32 : i32
    %c0_10 = arith.constant 0 : index
    %20 = arith.index_cast %19 : i32 to index
    %c0_11 = arith.constant 0 : index
    %c0_12 = arith.constant 0 : index
    %21 = vector.load %arg2[%c0_10, %20, %c0_11, %c0_12] : memref<1x16x16x4xf32, #tpu.memory_space<vmem>>, vector<1x1x16x4xf32>
    %22 = vector.shape_cast %21 : vector<1x1x16x4xf32> to vector<1x16x4xf32>
    %23 = vector.shape_cast %22 : vector<1x16x4xf32> to vector<16x4xf32>
    %c15_i32 = arith.constant 15 : i32
    %24 = arith.minsi %18, %c15_i32 : i32
    %c0_13 = arith.constant 0 : index
    %25 = arith.index_cast %24 : i32 to index
    %c0_14 = arith.constant 0 : index
    %c0_15 = arith.constant 0 : index
    %26 = vector.load %arg2[%c0_13, %25, %c0_14, %c0_15] : memref<1x16x16x4xf32, #tpu.memory_space<vmem>>, vector<1x1x16x4xf32>
    %27 = vector.shape_cast %26 : vector<1x1x16x4xf32> to vector<1x16x4xf32>
    %28 = vector.shape_cast %27 : vector<1x16x4xf32> to vector<16x4xf32>
    %29 = tpu.concatenate %23, %28 in 0 : vector<16x4xf32>, vector<16x4xf32> -> vector<32x4xf32>
    %c0_16 = arith.constant 0 : index
    %c0_17 = arith.constant 0 : index
    %30 = vector.load %arg3[%c0_16, %c0_17] : memref<4x20xf32, #tpu.memory_space<vmem>>, vector<4x20xf32>
    %cst_18 = arith.constant dense<0.000000e+00> : vector<32x20xf32>
    %31 = tpu.matmul %29, %30, %cst_18 {dimension_numbers = #tpu.dot_dimension_numbers<[1], [0], [0], [1], [0, 0, 1, 1], [], []>} : vector<32x4xf32>, vector<4x20xf32>, vector<32x20xf32> -> vector<32x20xf32>
    %32 = vector.extract_strided_slice %31 {offsets = [0, 0], sizes = [32, 4], strides = [1, 1]} : vector<32x20xf32> to vector<32x4xf32>
    %c0_19 = arith.constant 0 : index
    %c0_20 = arith.constant 0 : index
    %33 = vector.load %arg4[%c0_19, %c0_20] : memref<1x4xf32, #tpu.memory_space<vmem>>, vector<1x4xf32>
    %34 = vector.broadcast %33 : vector<1x4xf32> to vector<32x4xf32>
    %35 = arith.addf %32, %34 : vector<32x4xf32>
    %cst_21 = arith.constant 0.000000e+00 : f32
    %36 = vector.broadcast %cst_21 : f32 to vector<32x4xf32>
    %37 = arith.maximumf %35, %36 : vector<32x4xf32>
    %c0_i32_22 = arith.constant 0 : i32
    %38 = arith.cmpi sge, %17, %c0_i32_22 : i32
    %cst_23 = arith.constant 1.000000e+00 : f32
    %cst_24 = arith.constant 0.000000e+00 : f32
    %39 = arith.select %38, %cst_23, %cst_24 : f32
    %c15_i32_25 = arith.constant 15 : i32
    %40 = arith.cmpi sle, %18, %c15_i32_25 : i32
    %cst_26 = arith.constant 1.000000e+00 : f32
    %cst_27 = arith.constant 0.000000e+00 : f32
    %41 = arith.select %40, %cst_26, %cst_27 : f32
    %cst_28 = arith.constant 0.000000e+00 : f32
    %42 = vector.broadcast %cst_28 : f32 to vector<10x1x4xf32>
    %c0_29 = arith.constant 0 : index
    %c7 = arith.constant 7 : index
    %c0_30 = arith.constant 0 : index
    %43 = vector.load %arg11[%c0_29, %c7, %c0_30] : memref<10x32x4xf32, #tpu.memory_space<vmem>>, vector<10x1x4xf32>
    tpu.vector_store %arg11[%c0_29, %c7, %c0_30], %42 {strides = array<i32>} : memref<10x32x4xf32, #tpu.memory_space<vmem>>, vector<10x1x4xf32>,
    %c0_31 = arith.constant 0 : index
    %c24 = arith.constant 24 : index
    %c0_32 = arith.constant 0 : index
    %44 = vector.load %arg11[%c0_31, %c24, %c0_32] : memref<10x32x4xf32, #tpu.memory_space<vmem>>, vector<10x1x4xf32>
    tpu.vector_store %arg11[%c0_31, %c24, %c0_32], %42 {strides = array<i32>} : memref<10x32x4xf32, #tpu.memory_space<vmem>>, vector<10x1x4xf32>,
    %45 = vector.shape_cast %12 : vector<128x4xf32> to vector<8x16x4xf32>
    %c1 = arith.constant 1 : index
    %c8 = arith.constant 8 : index
    %c0_33 = arith.constant 0 : index
    %46 = vector.load %arg11[%c1, %c8, %c0_33] : memref<10x32x4xf32, #tpu.memory_space<vmem>>, vector<8x16x4xf32>
    tpu.vector_store %arg11[%c1, %c8, %c0_33], %45 {strides = array<i32>} : memref<10x32x4xf32, #tpu.memory_space<vmem>>, vector<8x16x4xf32>,
    %47 = vector.extract_strided_slice %37 {offsets = [0, 0], sizes = [16, 4], strides = [1, 1]} : vector<32x4xf32> to vector<16x4xf32>
    %48 = vector.broadcast %39 : f32 to vector<16x4xf32>
    %49 = arith.mulf %47, %48 : vector<16x4xf32>
    %50 = vector.shape_cast %49 : vector<16x4xf32> to vector<1x16x4xf32>
    %c0_34 = arith.constant 0 : index
    %c8_35 = arith.constant 8 : index
    %c0_36 = arith.constant 0 : index
    %51 = vector.load %arg11[%c0_34, %c8_35, %c0_36] : memref<10x32x4xf32, #tpu.memory_space<vmem>>, vector<1x16x4xf32>
    tpu.vector_store %arg11[%c0_34, %c8_35, %c0_36], %50 {strides = array<i32>} : memref<10x32x4xf32, #tpu.memory_space<vmem>>, vector<1x16x4xf32>,
    %52 = vector.extract_strided_slice %37 {offsets = [16, 0], sizes = [16, 4], strides = [1, 1]} : vector<32x4xf32> to vector<16x4xf32>
    %53 = vector.broadcast %41 : f32 to vector<16x4xf32>
    %54 = arith.mulf %52, %53 : vector<16x4xf32>
    %55 = vector.shape_cast %54 : vector<16x4xf32> to vector<1x16x4xf32>
    %c9 = arith.constant 9 : index
    %c8_37 = arith.constant 8 : index
    %c0_38 = arith.constant 0 : index
    %56 = vector.load %arg11[%c9, %c8_37, %c0_38] : memref<10x32x4xf32, #tpu.memory_space<vmem>>, vector<1x16x4xf32>
    tpu.vector_store %arg11[%c9, %c8_37, %c0_38], %55 {strides = array<i32>} : memref<10x32x4xf32, #tpu.memory_space<vmem>>, vector<1x16x4xf32>,
    %c0_39 = arith.constant 0 : index
    %c0_40 = arith.constant 0 : index
    %c0_41 = arith.constant 0 : index
    %57 = vector.load %arg11[%c0_39, %c0_40, %c0_41] : memref<10x32x4xf32, #tpu.memory_space<vmem>>, vector<10x32x4xf32>
    %58 = vector.extract_strided_slice %57 {offsets = [0, 7, 0], sizes = [8, 16, 4], strides = [1, 1, 1]} : vector<10x32x4xf32> to vector<8x16x4xf32>
    %59 = vector.shape_cast %58 : vector<8x16x4xf32> to vector<128x4xf32>
    %60 = vector.extract_strided_slice %57 {offsets = [0, 8, 0], sizes = [8, 16, 4], strides = [1, 1, 1]} : vector<10x32x4xf32> to vector<8x16x4xf32>
    %61 = vector.shape_cast %60 : vector<8x16x4xf32> to vector<128x4xf32>
    %62 = vector.extract_strided_slice %57 {offsets = [0, 9, 0], sizes = [8, 16, 4], strides = [1, 1, 1]} : vector<10x32x4xf32> to vector<8x16x4xf32>
    %63 = vector.shape_cast %62 : vector<8x16x4xf32> to vector<128x4xf32>
    %64 = vector.extract_strided_slice %57 {offsets = [1, 7, 0], sizes = [8, 16, 4], strides = [1, 1, 1]} : vector<10x32x4xf32> to vector<8x16x4xf32>
    %65 = vector.shape_cast %64 : vector<8x16x4xf32> to vector<128x4xf32>
    %66 = vector.extract_strided_slice %57 {offsets = [1, 8, 0], sizes = [8, 16, 4], strides = [1, 1, 1]} : vector<10x32x4xf32> to vector<8x16x4xf32>
    %67 = vector.shape_cast %66 : vector<8x16x4xf32> to vector<128x4xf32>
    %68 = vector.extract_strided_slice %57 {offsets = [1, 9, 0], sizes = [8, 16, 4], strides = [1, 1, 1]} : vector<10x32x4xf32> to vector<8x16x4xf32>
    %69 = vector.shape_cast %68 : vector<8x16x4xf32> to vector<128x4xf32>
    %70 = vector.extract_strided_slice %57 {offsets = [2, 7, 0], sizes = [8, 16, 4], strides = [1, 1, 1]} : vector<10x32x4xf32> to vector<8x16x4xf32>
    %71 = vector.shape_cast %70 : vector<8x16x4xf32> to vector<128x4xf32>
    %72 = vector.extract_strided_slice %57 {offsets = [2, 8, 0], sizes = [8, 16, 4], strides = [1, 1, 1]} : vector<10x32x4xf32> to vector<8x16x4xf32>
    %73 = vector.shape_cast %72 : vector<8x16x4xf32> to vector<128x4xf32>
    %74 = vector.extract_strided_slice %57 {offsets = [2, 9, 0], sizes = [8, 16, 4], strides = [1, 1, 1]} : vector<10x32x4xf32> to vector<8x16x4xf32>
    %75 = vector.shape_cast %74 : vector<8x16x4xf32> to vector<128x4xf32>
    %76 = tpu.concatenate %59, %61, %63, %65, %67, %69, %71, %73, %75 in 1 : vector<128x4xf32>, vector<128x4xf32>, vector<128x4xf32>, vector<128x4xf32>, vector<128x4xf32>, vector<128x4xf32>, vector<128x4xf32>, vector<128x4xf32>, vector<128x4xf32> -> vector<128x36xf32>
    %c0_42 = arith.constant 0 : index
    %c0_43 = arith.constant 0 : index
    %77 = vector.load %arg5[%c0_42, %c0_43] : memref<36x4xf32, #tpu.memory_space<vmem>>, vector<36x4xf32>
    %cst_44 = arith.constant dense<0.000000e+00> : vector<128x4xf32>
    %78 = tpu.matmul %76, %77, %cst_44 {dimension_numbers = #tpu.dot_dimension_numbers<[1], [0], [0], [1], [0, 0, 1, 1], [], []>} : vector<128x36xf32>, vector<36x4xf32>, vector<128x4xf32> -> vector<128x4xf32>
    %c0_45 = arith.constant 0 : index
    %c0_46 = arith.constant 0 : index
    %79 = vector.load %arg6[%c0_45, %c0_46] : memref<1x4xf32, #tpu.memory_space<vmem>>, vector<1x4xf32>
    %80 = vector.broadcast %79 : vector<1x4xf32> to vector<128x4xf32>
    %81 = arith.addf %78, %80 : vector<128x4xf32>
    %cst_47 = arith.constant 0.000000e+00 : f32
    %82 = vector.broadcast %cst_47 : f32 to vector<128x4xf32>
    %83 = arith.maximumf %81, %82 : vector<128x4xf32>
    %c0_48 = arith.constant 0 : index
    %c0_49 = arith.constant 0 : index
    %84 = vector.load %arg7[%c0_48, %c0_49] : memref<4x16xf32, #tpu.memory_space<vmem>>, vector<4x16xf32>
    %cst_50 = arith.constant dense<0.000000e+00> : vector<128x16xf32>
    %85 = tpu.matmul %83, %84, %cst_50 {dimension_numbers = #tpu.dot_dimension_numbers<[1], [0], [0], [1], [0, 0, 1, 1], [], []>} : vector<128x4xf32>, vector<4x16xf32>, vector<128x16xf32> -> vector<128x16xf32>
    %c0_51 = arith.constant 0 : index
    %c0_52 = arith.constant 0 : index
    %86 = vector.load %arg8[%c0_51, %c0_52] : memref<1x16xf32, #tpu.memory_space<vmem>>, vector<1x16xf32>
    %87 = vector.broadcast %86 : vector<1x16xf32> to vector<128x16xf32>
    %88 = arith.addf %85, %87 : vector<128x16xf32>
    %89 = arith.addf %88, %16 : vector<128x16xf32>
    %cst_53 = arith.constant 0.000000e+00 : f32
    %90 = vector.broadcast %cst_53 : f32 to vector<128x16xf32>
    %91 = arith.maximumf %89, %90 : vector<128x16xf32>
    %92 = vector.shape_cast %91 : vector<128x16xf32> to vector<8x16x16xf32>
    %c0_54 = arith.constant 0 : index
    %c0_55 = arith.constant 0 : index
    %c0_56 = arith.constant 0 : index
    %c0_57 = arith.constant 0 : index
    %93 = vector.load %arg10[%c0_54, %c0_55, %c0_56, %c0_57] : memref<1x8x16x16xf32, #tpu.memory_space<vmem>>, vector<1x8x16x16xf32>
    %94 = vector.shape_cast %93 : vector<1x8x16x16xf32> to vector<8x16x16xf32>
    %95 = vector.shape_cast %92 : vector<8x16x16xf32> to vector<1x8x16x16xf32>
    tpu.vector_store %arg10[%c0_54, %c0_55, %c0_56, %c0_57], %95 {strides = array<i32>} : memref<1x8x16x16xf32, #tpu.memory_space<vmem>>, vector<1x8x16x16xf32>,
    return
  }
  func.func @transform_0(%arg0: i32, %arg1: i32) -> (i32, i32, i32, i32) {
    %c0_i32 = arith.constant 0 : i32
    %c0_i32_0 = arith.constant 0 : i32
    %c0_i32_1 = arith.constant 0 : i32
    %c0_i32_2 = arith.constant 0 : i32
    return %arg0, %c0_i32, %c0_i32_0, %c0_i32_1 : i32, i32, i32, i32
  }
  func.func @transform_1(%arg0: i32, %arg1: i32) -> (i32, i32) {
    %c0_i32 = arith.constant 0 : i32
    %c0_i32_0 = arith.constant 0 : i32
    %c0_i32_1 = arith.constant 0 : i32
    return %c0_i32, %c0_i32_0 : i32, i32
  }
  func.func @transform_2(%arg0: i32, %arg1: i32) -> (i32, i32) {
    %c0_i32 = arith.constant 0 : i32
    %c0_i32_0 = arith.constant 0 : i32
    %c0_i32_1 = arith.constant 0 : i32
    return %c0_i32, %c0_i32_0 : i32, i32
  }
  func.func @transform_3(%arg0: i32, %arg1: i32) -> (i32, i32) {
    %c0_i32 = arith.constant 0 : i32
    %c0_i32_0 = arith.constant 0 : i32
    %c0_i32_1 = arith.constant 0 : i32
    return %c0_i32, %c0_i32_0 : i32, i32
  }
  func.func @transform_4(%arg0: i32, %arg1: i32) -> (i32, i32) {
    %c0_i32 = arith.constant 0 : i32
    %c0_i32_0 = arith.constant 0 : i32
    %c0_i32_1 = arith.constant 0 : i32
    return %c0_i32, %c0_i32_0 : i32, i32
  }
  func.func @transform_5(%arg0: i32, %arg1: i32) -> (i32, i32) {
    %c0_i32 = arith.constant 0 : i32
    %c0_i32_0 = arith.constant 0 : i32
    %c0_i32_1 = arith.constant 0 : i32
    return %c0_i32, %c0_i32_0 : i32, i32
  }
  func.func @transform_6(%arg0: i32, %arg1: i32) -> (i32, i32) {
    %c0_i32 = arith.constant 0 : i32
    %c0_i32_0 = arith.constant 0 : i32
    %c0_i32_1 = arith.constant 0 : i32
    return %c0_i32, %c0_i32_0 : i32, i32
  }
  func.func @transform_7(%arg0: i32, %arg1: i32) -> (i32, i32) {
    %c0_i32 = arith.constant 0 : i32
    %c0_i32_0 = arith.constant 0 : i32
    %c0_i32_1 = arith.constant 0 : i32
    return %c0_i32, %c0_i32_0 : i32, i32
  }
  func.func @transform_8(%arg0: i32, %arg1: i32) -> (i32, i32, i32, i32) {
    %c0_i32 = arith.constant 0 : i32
    %c0_i32_0 = arith.constant 0 : i32
    %c0_i32_1 = arith.constant 0 : i32
    return %arg0, %arg1, %c0_i32, %c0_i32_0 : i32, i32, i32, i32
  }
}

</mosaic_0001>

<bundles_post_ra>
// kernel: tpu_custom_call.1
= control target key start
LH: loop header
LB: loop body
LE: loop exit
PB: predicated region body
PF: predicated region fallthrough
CT: control target
= control target key end

     0   :  { %s3725_s0 = inlined_call_operand.vmem [shape: f32[2,16,16,4], index: 0, kind: input, shape index: {}]   ;;  %s3726_s1 = inlined_call_operand.vmem [shape: f32[4,20], index: 1, kind: input, shape index: {}]   ;;  %s3727_s2 = inlined_call_operand.vmem [shape: f32[1,4], index: 2, kind: input, shape index: {}]   ;;  %s3728_s3 = inlined_call_operand.vmem [shape: f32[36,4], index: 3, kind: input, shape index: {}]   ;;  %s3729_s4 = inlined_call_operand.vmem [shape: f32[1,4], index: 4, kind: input, shape index: {}]   ;;  %s3730_s5 = inlined_call_operand.vmem [shape: f32[4,16], index: 5, kind: input, shape index: {}]   ;;  %s3731_s6 = inlined_call_operand.vmem [shape: f32[1,16], index: 6, kind: input, shape index: {}]   ;;  %s3732_s7 = inlined_call_operand.vmem [shape: f32[1,16], index: 7, kind: input, shape index: {}]   ;;  %s3733_s8 = inlined_call_operand.hbm [shape: f32[2,16,16,16], index: 8, kind: output, shape index: {}]  }
   0x1   :  { %3770 = sst [smem:[#allocation50_spill]] %s3725_s0 }
   0x2   :  { %13 = vsyncpa [#allocation4], 0 }
   0x3   :  { %15 = vsyncpa [#allocation4 + $0x1], 0  ;;  %s2602_s27 = smov 0   ;;  %s2604_s28 = smov 0  }
   0x4   :  { %s2606_s29 = smov 0   ;;  %s2608_s30 = smov 0  }
   0x5   :  { %s2610_s9 = smov 0   ;;  %s2612_s10 = smov 0  }
   0x6   :  { %s2614_s11 = smov 0   ;;  %s2616_s12 = smov 0  }
   0x7 LB: > { %s2130_s13 = sadd.s32 4294967295, %s2543_s12   ;;  %s2131_s14 = sadd.s32 4294967294, %s2543_s12   ;;  %s2543_s12 = sphi %s2616_s12, %s21_s12   ;;  %s2539_s11 = sphi %s2614_s11, %s3876_s11   ;;  %s2535_s10 = sphi %s2612_s10, %s3875_s10   ;;  %s2531_s9 = sphi %s2610_s9, %s3874_s9   ;;  %s2527_s30 = sphi %s2608_s30, %s3873_s30   ;;  %s2523_s29 = sphi %s2606_s29, %s3872_s29   ;;  %s2519_s28 = sphi %s2604_s28, %s3871_s28   ;;  %s2515_s27 = sphi %s2602_s27, %s3870_s27  }
   0x8   : > { %s30_s15 = sadd.s32 1, %s2535_s10  ;;  %s33_s16 = sadd.s32 1, %s2539_s11 }
   0x9   : > { %p31_p0 = scmp.ge.s32.totalorder %s30_s15, 2  ;;  %p225_p1 = scmp.ne.s32.totalorder %s2523_s29, %s2519_s28 }
   0xa   : > { %p226_p2 = scmp.eq.s32.totalorder %s2130_s13, 3  ;;  %p231_p5 = scmp.ne.s32.totalorder %s2519_s28, %s2515_s27 }
   0xb   : > { %s3878_s15 = smov (%p31_p0, %s30_s15), 0  ;;  %s3880_s16 = smov (!%p31_p0, %s33_s16), %s2539_s11 }
   0xc   : > { %s211_s17 = ssub.s32 %s2535_s10, %s3878_s15  ;;  %p2653_p3 = por %p226_p2, %p225_p1 }
   0xd   : > { %p35_p4 = scmp.ge.s32.totalorder %s3880_s16, 2  ;;  %p232_p6 = scmp.eq.s32.totalorder %s2131_s14, 3 }
   0xe   : > { %p2134_p7 = scmp.ge.s32.totalorder %s2543_s12, 1  ;;  %p279_p9 = scmp.lt.s32.totalorder %s2543_s12, 5 }
   0xf   : > { %s3882_s16 = smov (%p35_p4, %s3880_s16), 0  ;;  %p2662_p8 = por %p232_p6, %p231_p5 }
  0x10   : > { %s210_s20 = ssub.s32 %s2539_s11, %s3882_s16  ;;  %s215_s21 = sadd.s32 1, %s2523_s29 }
  0x11   : > { %s212_s22 = sor.u32 %s211_s17, %s210_s20  ;;  %p280_p10 = pnand %p2134_p7, %p279_p9 }
  0x12   : > { %p213_p11 = scmp.eq.s32.totalorder %s212_s22, 0 }
  0x13   : > { %283 = sbr.rel (%p280_p10) target bundleno = 1026 (0x402), region = 52 }
  0x14   : > { %s2671_s23 = scalar_select %p213_p11, %s2523_s29, %s215_s21  }
  0x18   : > { %v338_v0 = vld [vmem:[%s3726_s1] sm:$0xf]  ;;  %vm388_vm0 = vcmask 1043456   ;;  %p313_p12 = scmp.lt.s32.totalorder %s2531_s9, 1  ;;  %s2138_s26 = sshll.u32 %s2527_s30, 3  ;;  %vm339_vm1 = vcmask 31744  }
  0x19   : > { %2273 = vmatprep.subr.msk.mxu0 %vm388_vm0, %v338_v0  ;;  %2367 = vmatprep.subr.msk.mxu1 %vm388_vm0, %v338_v0  ;;  %s2211_s14 = sshll.u32 %s2527_s30, 7  ;;  %s2687_s17 = sadd.s32 4294967295, %s2138_s26  ;;  %vm724_vm2 = vcmask 24576   ;;  %v2545_v19 = vmov 0.0   ;;  %v2767_v22 = vld [vmem:[%s3727_s2] ss:$0 sm:$0xff] }
  0x1a   : > { %2274 = vmatpush3.msk.msra.mxu0 %vm388_vm0, %v338_v0  ;;  %2368 = vmatpush3.msk.msra.mxu1 %vm388_vm0, %v338_v0  ;;  %s314_s13 = scalar_select %p313_p12, %s2531_s9, 1  ;;  %742 = vst.msk [vmem:[#allocation2 + $0xf8] sm:$0x1] %vm724_vm2, %v2545_v19  ;;  %725 = vst.msk [vmem:[#allocation2 + $0x7] sm:$0x1] %vm724_vm2, %v2545_v19  ;;  %vm902_vm3 = vcmask 1046528  }
  0x1b   : > { %2299 = vmatprep.subr.msk.mxu1 %vm388_vm0, %v338_v0  ;;  %p603_p13 = scmp.gt.s32.totalorder %s2687_s17, 0  ;;  %s3773_s0 = sld [smem:[#allocation50_spill]]  ;;  %726 = vst.msk [vmem:[#allocation2 + $0x27] sm:$0x1] %vm724_vm2, %v2545_v19  ;;  %727 = vst.msk [vmem:[#allocation2 + $0x47] sm:$0x1] %vm724_vm2, %v2545_v19 }
  0x1c   : > { %s2210_s20 = sshll.u32 %s314_s13, 8  ;;  %728 = vst.msk [vmem:[#allocation2 + $0x67] sm:$0x1] %vm724_vm2, %v2545_v19  ;;  %729 = vst.msk [vmem:[#allocation2 + $0x87] sm:$0x1] %vm724_vm2, %v2545_v19  ;;  %s2757_s21 = sadd.s32 8, %s2138_s26 }
  0x1d   : > { %s604_s13 = scalar_select %p603_p13, %s2687_s17, 0  ;;  %730 = vst.msk [vmem:[#allocation2 + $0xa7] sm:$0x1] %vm724_vm2, %v2545_v19  ;;  %731 = vst.msk [vmem:[#allocation2 + $0xc7] sm:$0x1] %vm724_vm2, %v2545_v19  ;;  %vm837_vm4 = vcmask 1040384  }
  0x1e   : > { %732 = vst.msk [vmem:[#allocation2 + $0xe7] sm:$0x1] %vm724_vm2, %v2545_v19  ;;  %733 = vst.msk [vmem:[#allocation2 + $0x107] sm:$0x1] %vm724_vm2, %v2545_v19  ;;  %p609_p0 = scmp.lt.s32.totalorder %s2757_s21, 15  ;;  %p720_p1 = scmp.ge.s32.totalorder %s2687_s17, 0 }
  0x1f   : > { %734 = vst.msk [vmem:[#allocation2 + $0x127] sm:$0x1] %vm724_vm2, %v2545_v19  ;;  %735 = vst.msk [vmem:[#allocation2 + $0x18] sm:$0x1] %vm724_vm2, %v2545_v19  ;;  %s3734_s17 = smov 16   ;;  %p722_p2 = scmp.le.s32.totalorder %s2757_s21, 15 }
  0x20   : > { %736 = vst.msk [vmem:[#allocation2 + $0x38] sm:$0x1] %vm724_vm2, %v2545_v19  ;;  %737 = vst.msk [vmem:[#allocation2 + $0x58] sm:$0x1] %vm724_vm2, %v2545_v19  ;;  %s610_s22 = scalar_select %p609_p0, %s2757_s21, 15  ;;  %vm1371_vm5 = vcmask 64512  }
  0x21   : > { %s2693_s24 = scalar_lea.vmem %s3773_s0, %s2210_s20  ;;  %738 = vst.msk [vmem:[#allocation2 + $0x78] sm:$0x1] %vm724_vm2, %v2545_v19  ;;  %739 = vst.msk [vmem:[#allocation2 + $0x98] sm:$0x1] %vm724_vm2, %v2545_v19  ;;  %s3791_s21 = smov 16   ;;  %vm1388_vm6 = vcmask 97280  }
  0x22   : > { %s2696_s25 = scalar_lea.vmem %s2693_s24, %s2211_s14  ;;  %s2160_s14 = sshll.u32 %s604_s13, 4  ;;  %740 = vst.msk [vmem:[#allocation2 + $0xb8] sm:$0x1] %vm724_vm2, %v2545_v19  ;;  %741 = vst.msk [vmem:[#allocation2 + $0xd8] sm:$0x1] %vm724_vm2, %v2545_v19  ;;  %vm1405_vm7 = vcmask 130048  }
  0x23   : > { %v322_v1 = vld [vmem:[%s2696_s25] sm:$0xff]  ;;  %v323_v3 = vld [vmem:[%s2696_s25 + $0x8] sm:$0xff]  ;;  %v324_v5 = vld [vmem:[%s2696_s25 + $0x10] sm:$0xff]  ;;  %s606_s20 = scalar_lea.vmem %s2693_s24, %s2160_s14  ;;  %743 = vst.msk [vmem:[#allocation2 + $0x118] sm:$0x1] %vm724_vm2, %v2545_v19  ;;  %s3740_s14 = smov 12  }
  0x24   : > { %v334_v2 = vld [vmem:[%s2696_s25 + $0x60] sm:$0xff]  ;;  %2275 = vmatprep.mubr.msk.f32.mxu0 %vm339_vm1, %v322_v1  ;;  %v335_v4 = vld [vmem:[%s2696_s25 + $0x68] sm:$0xff]  ;;  %v336_v6 = vld [vmem:[%s2696_s25 + $0x70] sm:$0xff]  ;;  %744 = vst.msk [vmem:[#allocation2 + $0x138] sm:$0x1] %vm724_vm2, %v2545_v19  ;;  %vm1422_vm8 = vcmask 162816  }
  0x25   : > { %2293 = vmatprep.mubr.msk.f32.mxu1 %vm339_vm1, %v334_v2  ;;  %2276 = vmatmul.mubr.msk.f32.vlgmr.msra.gmra.mxu0 %vm339_vm1, %v323_v3  ;;  %v325_v7 = vld [vmem:[%s2696_s25 + $0x18] sm:$0xff]  ;;  %v326_v9 = vld [vmem:[%s2696_s25 + $0x20] sm:$0xff]  ;;  %v327_v11 = vld [vmem:[%s2696_s25 + $0x28] sm:$0xff]  ;;  %s2802_s26 = scalar_select %p720_p1, 1.0, 0.0  ;;  %vm1439_vm9 = vcmask 195584  }
  0x26   : > { %2294 = vmatmul.mubr.msk.f32.vlgmr.msra.gmra.mxu1 %vm339_vm1, %v335_v4  ;;  %2278 = vmatprep.mubr.msk.f32.mxu0 %vm339_vm1, %v324_v5  ;;  %v337_v8 = vld [vmem:[%s2696_s25 + $0x78] sm:$0xff]  ;;  %v607_v10 = vld [vmem:[%s606_s20] sm:$0xff]  ;;  %v608_v12 = vld [vmem:[%s606_s20 + $0x8] sm:$0xff]  ;;  %s3769_s20 = smov 8   ;;  %vm1456_vm10 = vcmask 228352   ;;  %vm1473_vm11 = vcmask 261120  }
  0x27   : > { %2296 = vmatprep.mubr.msk.f32.mxu1 %vm339_vm1, %v336_v6  ;;  %2300 = vmatpush3.msk.msra.mxu1 %vm388_vm0, %v338_v0  ;;  %v328_v13 = vld [vmem:[%s2696_s25 + $0x30] sm:$0xff]  ;;  %v329_v14 = vld [vmem:[%s2696_s25 + $0x38] sm:$0xff]  ;;  %v330_v15 = vld [vmem:[%s2696_s25 + $0x40] sm:$0xff]  ;;  %v762_v52 = vstv %s2802_s26  ;;  %s3744_s26 = smov 24   ;;  %vm1502_vm12 = vcmask 293888  }
  0x28   : > { %v331_v16 = vld [vmem:[%s2696_s25 + $0x48] sm:$0xff]  ;;  %v332_v17 = vld [vmem:[%s2696_s25 + $0x50] sm:$0xff]  ;;  %v333_v18 = vld [vmem:[%s2696_s25 + $0x58] sm:$0xff]  ;;  %s2161_s25 = sshll.u32 %s610_s22, 4  ;;  %s3738_s22 = smov 28  }
  0x29   : > { %2279 = vmatmul.mubr.msk.f32.gmra.mxu0 %vm339_vm1, %v325_v7  ;;  %s612_s13 = scalar_lea.vmem %s2693_s24, %s2161_s25  ;;  %s2547_s24 = smov 4   ;;  %v804_v7 = vld [vmem:[#allocation2 + $0xf8] sm:$0xff] }
  0x2a   : > { %2297 = vmatmul.mubr.msk.f32.gmra.mxu1 %vm339_vm1, %v337_v8  ;;  %2281 = vmatprep.mubr.msk.f32.mxu0 %vm339_vm1, %v326_v9  ;;  %v613_v20 = vld [vmem:[%s612_s13] sm:$0xff]  ;;  %v614_v21 = vld [vmem:[%s612_s13 + $0x8] sm:$0xff]  ;;  %s3742_s25 = smov 32   ;;  %s3736_s13 = smov 20  }
  0x2b   : > { %2301 = vmatprep.mubr.msk.f32.mxu1 %vm339_vm1, %v607_v10  ;;  %v941_v10 = vrot.slane %v804_v7, 1 }
  0x2d   : > { %2282 = vmatmul.mubr.msk.f32.gmra.mxu0 %vm339_vm1, %v327_v11 }
  0x2e   : > { %2302 = vmatmul.mubr.msk.f32.vlgmr.msra.gmra.mxu1 %vm339_vm1, %v608_v12  ;;  %2284 = vmatprep.mubr.msk.f32.mxu0 %vm339_vm1, %v328_v13  ;;  %v780_v12 = vld [vmem:[#allocation2 + $0x38] sm:$0xff] }
  0x2f   : > { %2304 = vmatprep.mubr.msk.f32.mxu1 %vm339_vm1, %v613_v20 }
  0x31   : > { %2285 = vmatmul.mubr.msk.f32.gmra.mxu0 %vm339_vm1, %v329_v14 }
  0x32   : > { %2287 = vmatprep.mubr.msk.f32.mxu0 %vm339_vm1, %v330_v15  ;;  %2305 = vmatmul.mubr.msk.f32.gmra.mxu1 %vm339_vm1, %v614_v21  ;;  %v911_v15 = vrot.slane %v780_v12, 1 }
  0x35   : > { %2288 = vmatmul.mubr.msk.f32.gmra.mxu0 %vm339_vm1, %v331_v16 }
  0x36   : > { %2290 = vmatprep.mubr.msk.f32.mxu0 %vm339_vm1, %v332_v17 }
  0x39   : > { %2291 = vmatmul.mubr.msk.f32.gmra.mxu0 %vm339_vm1, %v333_v18 }
  0xe5   : > { %v2769_v23 = vpop.f32.mrf.mxu0 }
  0xe6   : > { %3774 = vst [vmem:[#allocation6_spill] sm:$0xff] %v2769_v23  ;;  %v2771_v24 = vpop.f32.mrf.mxu1  ;;  %v545_v25 = vadd.f32 %v2769_v23, %v2767_v22 }
  0xe7   : > { %3775 = vst [vmem:[#allocation7_spill] sm:$0xff] %v2771_v24  ;;  %v557_v26 = vadd.f32 %v2771_v24, %v2767_v22  ;;  %v2777_v27 = vpop.f32.mrf.mxu0 }
  0xe8   : > { %3776 = vst [vmem:[#allocation8_spill] sm:$0xff] %v2777_v27  ;;  %v2779_v28 = vpop.f32.mrf.mxu1  ;;  %v561_v29 = vmax.f32 %v545_v25, 0.0  ;;  %v544_v31 = vadd.f32 %v2767_v22, %v2777_v27 }
  0xe9   : > { %3777 = vst [vmem:[#allocation9_spill] sm:$0xff] %v2779_v28  ;;  %v573_v30 = vmax.f32 %v557_v26, 0.0  ;;  %v556_v32 = vadd.f32 %v2767_v22, %v2779_v28  ;;  %v2786_v33 = vpop.f32.mrf.mxu0 }
  0xea   : > { %3778 = vst [vmem:[#allocation10_spill] sm:$0xff] %v2786_v33  ;;  %v2788_v34 = vpop.f32.mrf.mxu1  ;;  %747 = vst.msk [vmem:[#allocation2 + $0x30] sm:$0xff] %vm339_vm1, %v561_v29  ;;  %v560_v35 = vmax.f32 %v544_v31, 0.0  ;;  %v547_v37 = vadd.f32 %v2786_v33, %v2767_v22 }
  0xeb   : > { %3779 = vst [vmem:[#allocation11_spill] sm:$0xff] %v2788_v34  ;;  %759 = vst.msk [vmem:[#allocation2 + $0xf0] sm:$0xff] %vm339_vm1, %v573_v30  ;;  %v572_v36 = vmax.f32 %v556_v32, 0.0  ;;  %v559_v38 = vadd.f32 %v2788_v34, %v2767_v22  ;;  %v2796_v39 = vpop.f32.mrf.mxu0 }
  0xec   : > { %3780 = vst [vmem:[#allocation12_spill] sm:$0xff] %v2796_v39  ;;  %v2798_v40 = vpop.f32.mrf.mxu1  ;;  %746 = vst.msk [vmem:[#allocation2 + $0x28] sm:$0xff] %vm339_vm1, %v560_v35  ;;  %v563_v41 = vmax.f32 %v547_v37, 0.0  ;;  %v546_v42 = vadd.f32 %v2767_v22, %v2796_v39  ;;  %v801_v35 = vld [vmem:[#allocation2 + $0xe0] sm:$0xff] }
  0xed   : > { %3781 = vst [vmem:[#allocation13_spill] sm:$0xff] %v2798_v40  ;;  %758 = vst.msk [vmem:[#allocation2 + $0xe8] sm:$0xff] %vm339_vm1, %v572_v36  ;;  %v575_v43 = vmax.f32 %v559_v38, 0.0  ;;  %v558_v44 = vadd.f32 %v2767_v22, %v2798_v40  ;;  %v2810_v45 = vpop.f32.mrf.mxu0  ;;  %v873_v36 = vrot.slane %v801_v35, 7 }
  0xee   : > { %3782 = vst [vmem:[#allocation14_spill] sm:$0xff] %v2810_v45  ;;  %v2303_v46 = vpop.f32.mrf.mxu1  ;;  %749 = vst.msk [vmem:[#allocation2 + $0x50] sm:$0xff] %vm339_vm1, %v563_v41  ;;  %v562_v47 = vmax.f32 %v546_v42, 0.0  ;;  %v549_v49 = vadd.f32 %v2810_v45, %v2767_v22 }
  0xef   : > { %761 = vst.msk [vmem:[#allocation2 + $0x110] sm:$0xff] %vm339_vm1, %v575_v43  ;;  %v574_v48 = vmax.f32 %v558_v44, 0.0  ;;  %v713_v50 = vadd.f32 %v2303_v46, %v2767_v22  ;;  %v2817_v51 = vpop.f32.mrf.mxu0  ;;  %v777_v44 = vld [vmem:[#allocation2 + $0x20] sm:$0xff] }
  0xf0   : > { %3783 = vst [vmem:[#allocation15_spill] sm:$0xff] %v2817_v51  ;;  %v693_v53 = vpop.f32.mrf.mxu1  ;;  %748 = vst.msk [vmem:[#allocation2 + $0x48] sm:$0xff] %vm339_vm1, %v562_v47  ;;  %v565_v54 = vmax.f32 %v549_v49, 0.0  ;;  %v548_v55 = vadd.f32 %v2767_v22, %v2817_v51 }
  0xf1   : > { %760 = vst.msk [vmem:[#allocation2 + $0x108] sm:$0xff] %vm339_vm1, %v574_v48  ;;  %v717_v56 = vmax.f32 %v713_v50, 0.0  ;;  %v712_v57 = vadd.f32 %v2767_v22, %v693_v53  ;;  %v2827_v59 = vld [vmem:[#allocation2 + $0x30] sm:$0xff]  ;;  %v2829_v60 = vpop.f32.mrf.mxu0  ;;  %v843_v48 = vrot.slane %v777_v44, 7 }
  0xf2   : > { %v2825_v58 = vld [vmem:[#allocation2 + $0xf0] sm:$0xff]  ;;  %3784 = vst [vmem:[#allocation16_spill] sm:$0xff] %v2829_v60  ;;  %1117 = vrot.lane.b32.xlu0 %v2827_v59, %s3734_s17  ;;  %751 = vst.msk [vmem:[#allocation2 + $0x70] sm:$0xff] %vm339_vm1, %v565_v54  ;;  %v564_v61 = vmax.f32 %v548_v55, 0.0  ;;  %v551_v0 = vadd.f32 %v2829_v60, %v2767_v22  ;;  %v909_v14 = vrot.slane %v2827_v59, 1  ;;  %v846_v19 = vrot.slane %v2827_v59, 7 }
  0xf3   : > { %1141 = vrot.lane.b32.xlu1 %v2825_v58, %s3734_s17  ;;  %v764_v62 = vmul.f32 %v762_v52, %v717_v56  ;;  %v716_v63 = vmax.f32 %v712_v57, 0.0  ;;  %v2838_v1 = vld [vmem:[#allocation2 + $0x28] sm:$0xff]  ;;  %v2846_v4 = vpop.f32.mrf.mxu0  ;;  %v939_v9 = vrot.slane %v2825_v58, 1  ;;  %v876_v55 = vrot.slane %v2825_v58, 7  ;;  %v793_v60 = vld [vmem:[#allocation2 + $0xa0] sm:$0xff] }
  0xf4   : > { %750 = vst.msk [vmem:[#allocation2 + $0x68] sm:$0xff] %vm339_vm1, %v564_v61  ;;  %v567_v3 = vmax.f32 %v551_v0, 0.0  ;;  %3785 = vst [vmem:[#allocation17_spill] sm:$0xff] %v2846_v4  ;;  %v2850_v5 = vld [vmem:[#allocation2 + $0xe8] sm:$0xff]  ;;  %v550_v6 = vadd.f32 %v2767_v22, %v2846_v4  ;;  %v844_v16 = vrot.slane %v2838_v1, 7  ;;  %v912_v26 = vsel %vm902_vm3, %v909_v14, %v911_v15  ;;  %v781_v0 = vld [vmem:[#allocation2 + $0x40] sm:$0xff] }
  0xf5   : > { %766 = vst.msk [vmem:[#allocation2 + $0x10] sm:$0xff] %vm339_vm1, %v764_v62  ;;  %v763_v2 = vmul.f32 %v762_v52, %v716_v63  ;;  %v942_v11 = vsel %vm902_vm3, %v939_v9, %v941_v10  ;;  %v2868_v13 = vld [vmem:[#allocation2 + $0x50] sm:$0xff]  ;;  %v2872_v17 = vpop.f32.mrf.mxu0  ;;  %v908_v30 = vrot.slane %v2838_v1, 1  ;;  %v874_v37 = vrot.slane %v2850_v5, 7 }
  0xf6   : > { %977 = vrot.lane.b32.xlu0 %v2827_v59, %s2547_s24  ;;  %753 = vst.msk [vmem:[#allocation2 + $0x90] sm:$0xff] %vm339_vm1, %v567_v3  ;;  %v566_v8 = vmax.f32 %v550_v6, 0.0  ;;  %3786 = vst [vmem:[#allocation18_spill] sm:$0xff] %v2872_v17  ;;  %v553_v18 = vadd.f32 %v2872_v17, %v2767_v22  ;;  %v2887_v29 = vsel %vm837_vm4, %v844_v16, %v846_v19  ;;  %v938_v41 = vrot.slane %v2850_v5, 1  ;;  %v2916_v43 = vld [vmem:[#allocation2 + $0x110] sm:$0xff] }
  0xf7   : > { %975 = vrot.lane.b32.xlu1 %v2838_v1, %s2547_s24  ;;  %765 = vst.msk [vmem:[#allocation2 + $0x8] sm:$0xff] %vm339_vm1, %v763_v2  ;;  %v2881_v20 = vpop.f32.mrf.mxu0  ;;  %v910_v32 = vsel %vm902_vm3, %v908_v30, %v909_v14  ;;  %v2902_v38 = vsel %vm837_vm4, %v873_v36, %v874_v37  ;;  %v782_v47 = vld [vmem:[#allocation2 + $0x48] sm:$0xff]  ;;  %v2933_v54 = vsel %vm837_vm4, %v843_v48, %v844_v16  ;;  %v914_v61 = vrot.slane %v2868_v13, 1  ;;  %v2306_v16 = vpop.f32.mrf.mxu1 }
  0xf8   : > { %752 = vst.msk [vmem:[#allocation2 + $0x88] sm:$0xff] %vm339_vm1, %v566_v8  ;;  %3787 = vst [vmem:[#allocation19_spill] sm:$0xff] %v2881_v20  ;;  %v569_v21 = vmax.f32 %v553_v18, 0.0  ;;  %v552_v25 = vadd.f32 %v2767_v22, %v2881_v20  ;;  %v940_v42 = vsel %vm902_vm3, %v938_v41, %v939_v9  ;;  %v2942_v57 = vsel %vm837_vm4, %v874_v37, %v876_v55  ;;  %v806_v59 = vld [vmem:[#allocation2 + $0x108] sm:$0xff]  ;;  %v805_v8 = vld [vmem:[#allocation2 + $0x100] sm:$0xff] }
  0xf9   : > { %v2921_v46 = vpop.f32.mrf.mxu0  ;;  %3790 = vst [vmem:[#allocation22_spill] sm:$0xff] %v2942_v57  ;;  %v848_v2 = vrot.slane %v781_v0, 7  ;;  %v849_v3 = vrot.slane %v782_v47, 7  ;;  %v913_v6 = vrot.slane %v782_v47, 1  ;;  %v946_v9 = vrot.slane %v805_v8, 7  ;;  %v788_v41 = vld [vmem:[#allocation2 + $0x78] sm:$0xff] }
  0xfa   : > { %1281 = vrot.lane.b32.xlu0 %v2825_v58, %s3738_s22  ;;  %755 = vst.msk [vmem:[#allocation2 + $0xb0] sm:$0xff] %vm339_vm1, %v569_v21  ;;  %v568_v31 = vmax.f32 %v552_v25, 0.0  ;;  %3788 = vst [vmem:[#allocation20_spill] sm:$0xff] %v2921_v46  ;;  %v555_v49 = vadd.f32 %v2921_v46, %v2767_v22  ;;  %v947_v10 = vrot.slane %v806_v59, 7  ;;  %v952_v15 = vrot.slane %v806_v59, 1  ;;  %v703_v21 = vpop.f32.mrf.mxu1 }
  0xfb   : > { %1279 = vrot.lane.b32.xlu1 %v2850_v5, %s3738_s22  ;;  %v2928_v50 = vpop.f32.mrf.mxu0  ;;  %v915_v7 = vsel %vm902_vm3, %v913_v6, %v914_v61  ;;  %v715_v18 = vadd.f32 %v2306_v16, %v2767_v22  ;;  %v863_v39 = vrot.slane %v793_v60, 7 }
  0xfc   : > { %754 = vst.msk [vmem:[#allocation2 + $0xa8] sm:$0xff] %vm339_vm1, %v568_v31  ;;  %3789 = vst [vmem:[#allocation21_spill] sm:$0xff] %v2928_v50  ;;  %v571_v52 = vmax.f32 %v555_v49, 0.0  ;;  %v554_v53 = vadd.f32 %v2767_v22, %v2928_v50  ;;  %v948_v12 = vsel %vm837_vm4, %v946_v9, %v947_v10  ;;  %v949_v31 = vrot.slane %v2916_v43, 7 }
  0xfd   : > { %v719_v25 = vmax.f32 %v715_v18, 0.0  ;;  %v3016_v55 = vld [vmem:[#allocation2 + $0x90] sm:$0xff] }
  0xfe   : > { %1001 = vrot.lane.b32.xlu0 %v2825_v58, %s2547_s24  ;;  %757 = vst.msk [vmem:[#allocation2 + $0xd0] sm:$0xff] %vm339_vm1, %v571_v52  ;;  %v570_v56 = vmax.f32 %v554_v53, 0.0  ;;  %v784_v58 = vld [vmem:[#allocation2 + $0x58] sm:$0xff]  ;;  %v950_v37 = vsel %vm837_vm4, %v947_v10, %v949_v31  ;;  %v3039_v9 = vld [vmem:[#allocation2 + $0x8] sm:$0xff] }
  0xff   : > { %1139 = vrot.lane.b32.xlu1 %v2850_v5, %s3734_s17  ;;  %v916_v62 = vrot.slane %v784_v58, 1  ;;  %v776_v53 = vld [vmem:[#allocation2 + $0x18] sm:$0xff] }
 0x100   : > { %756 = vst.msk [vmem:[#allocation2 + $0xc8] sm:$0xff] %vm339_vm1, %v570_v56 }
 0x101   : > { %v917_v63 = vsel %vm902_vm3, %v914_v61, %v916_v62  ;;  %v906_v61 = vrot.slane %v776_v53, 1  ;;  %v785_v62 = vld [vmem:[#allocation2 + $0x60] sm:$0xff]  ;;  %v792_v53 = vld [vmem:[#allocation2 + $0x98] sm:$0xff] }
 0x102   : > { %1115 = vrot.lane.b32.xlu0 %v2838_v1, %s3734_s17  ;;  %v2954_v1 = vld [vmem:[#allocation2 + $0x70] sm:$0xff] }
 0x103   : > { %1329 = vrot.lane.b32.xlu1 %v942_v11, %s3742_s25  ;;  %v919_v44 = vrot.slane %v2954_v1, 1 }
 0x105   : > { %v3190_v51 = vld [vmem:[#allocation2 + $0xd0] sm:$0xff] }
 0x106   : > { %999 = vrot.lane.b32.xlu0 %v2850_v5, %s2547_s24  ;;  %v2960_v5 = vsel %vm837_vm4, %v848_v2, %v849_v3 }
 0x107   : > { %1121 = vrot.lane.b32.xlu1 %v2868_v13, %s3734_s17 }
 0x10a   : > { %1165 = vrot.lane.b32.xlu0 %v912_v26, %s3736_s13 }
 0x10b   : > { %1069 = vrot.lane.b32.xlu1 %v2887_v29, %s3740_s14 }
 0x10e   : > { %1025 = vrot.lane.b32.xlu0 %v912_v26, %s3769_s20  ;;  %v714_v26 = vadd.f32 %v2767_v22, %v703_v21  ;;  %v786_v22 = vld [vmem:[#allocation2 + $0x68] sm:$0xff]  ;;  %v856_v21 = vrot.slane %v2954_v1, 7 }
 0x10f   : > { %1163 = vrot.lane.b32.xlu1 %v910_v32, %s3736_s13  ;;  %v854_v6 = vrot.slane %v786_v22, 7 }
 0x110   : > { %v718_v35 = vmax.f32 %v714_v26, 0.0 }
 0x111   : > { %v3075_v31 = vsel %vm837_vm4, %v854_v6, %v856_v21 }
 0x112   : > { %1189 = vrot.lane.b32.xlu0 %v942_v11, %s3736_s13 }
 0x113   : > { %1023 = vrot.lane.b32.xlu1 %v910_v32, %s3769_s20 }
 0x116   : > { %1049 = vrot.lane.b32.xlu0 %v942_v11, %s3769_s20  ;;  %v851_v11 = vrot.slane %v2868_v13, 7 }
 0x117   : > { %1231 = vrot.lane.b32.xlu1 %v2902_v38, %s3744_s26 }
 0x118   : > { %v2978_v14 = vsel %vm837_vm4, %v849_v3, %v851_v11  ;;  %v853_v3 = vrot.slane %v785_v62, 7 }
 0x11a   : > { %1261 = vrot.lane.b32.xlu0 %v2868_v13, %s3738_s22  ;;  %v3042_v10 = vsel %vm837_vm4, %v853_v3, %v854_v6  ;;  %v924_v3 = vrot.slane %v3016_v55, 1  ;;  %v926_v6 = vrot.slane %v792_v53, 1 }
 0x11b   : > { %1091 = vrot.lane.b32.xlu1 %v2902_v38, %s3740_s14 }
 0x11c   : > { %v927_v21 = vsel %vm902_vm3, %v924_v3, %v926_v6 }
 0x11e   : > { %981 = vrot.lane.b32.xlu0 %v2868_v13, %s2547_s24  ;;  %v3746_v13 = vrot.slane %v2916_v43, 1 }
 0x11f   : > { %1327 = vrot.lane.b32.xlu1 %v940_v42, %s3742_s25 }
 0x120   : > { %v954_v30 = vsel %vm902_vm3, %v952_v15, %v3746_v13  ;;  %v918_v15 = vrot.slane %v786_v22, 1  ;;  %v861_v13 = vrot.slane %v3016_v55, 7 }
 0x122   : > { %1285 = vrot.lane.b32.xlu0 %v2916_v43, %s3738_s22 }
 0x123   : > { %1047 = vrot.lane.b32.xlu1 %v940_v42, %s3769_s20 }
 0x126   : > { %1145 = vrot.lane.b32.xlu0 %v2916_v43, %s3734_s17 }
 0x127   : > { %1259 = vrot.lane.b32.xlu1 %v782_v47, %s3738_s22 }
 0x12a   : > { %1067 = vrot.lane.b32.xlu0 %v2933_v54, %s3740_s14 }
 0x12b   : > { %1119 = vrot.lane.b32.xlu1 %v782_v47, %s3734_s17 }
 0x12e   : > { %1233 = vrot.lane.b32.xlu0 %v2942_v57, %s3744_s26 }
 0x12f   : > { %1283 = vrot.lane.b32.xlu1 %v806_v59, %s3738_s22 }
 0x132   : > { %1093 = vrot.lane.b32.xlu0 %v2942_v57, %s3740_s14 }
 0x133   : > { %1143 = vrot.lane.b32.xlu1 %v806_v59, %s3734_s17 }
 0x136   : > { %1187 = vrot.lane.b32.xlu0 %v940_v42, %s3736_s13  ;;  %v3003_v42 = vld [vmem:[#allocation2 + $0x10] sm:$0xff] }
 0x137   : > { %1309 = vrot.lane.b32.xlu1 %v917_v63, %s3742_s25  ;;  %v904_v58 = vrot.slane %v3003_v42, 1 }
 0x139   : > { %v907_v2 = vsel %vm902_vm3, %v904_v58, %v906_v61 }
 0x13a   : > { %979 = vrot.lane.b32.xlu0 %v782_v47, %s2547_s24  ;;  %v921_v47 = vrot.slane %v788_v41, 1 }
 0x13b   : > { %1125 = vrot.lane.b32.xlu1 %v2954_v1, %s3734_s17  ;;  %s723_s17 = scalar_select %p722_p2, 1.0, 0.0 }
 0x13c   : > { %v922_v52 = vsel %vm902_vm3, %v919_v44, %v921_v47  ;;  %v1490_v47 = vld [vmem:[%s3728_s3] sm:$0xff] }
 0x13d   : > { %v767_v19 = vstv %s723_s17  ;;  %s2554_s17 = smov 124  }
 0x13e   : > { %1169 = vrot.lane.b32.xlu0 %v917_v63, %s3736_s13  ;;  %v769_v32 = vmul.f32 %v767_v19, %v719_v25  ;;  %v768_v36 = vmul.f32 %v767_v19, %v718_v35  ;;  %v920_v19 = vsel %vm902_vm3, %v918_v15, %v919_v44  ;;  %v1494_v25 = vld [vmem:[%s3728_s3 + $0x20] sm:$0xf] }
 0x13f   : > { %1211 = vrot.lane.b32.xlu1 %v2960_v5, %s3744_s26  ;;  %2307 = vmatprep.subr.msk.mxu1 %vm388_vm0, %v1494_v25 }
 0x140   : > { %772 = vst.msk [vmem:[#allocation2 + $0x130] sm:$0xff] %vm339_vm1, %v769_v32  ;;  %771 = vst.msk [vmem:[#allocation2 + $0x128] sm:$0xff] %vm339_vm1, %v768_v36  ;;  %2308 = vmatpush3.msk.msra.mxu1 %vm388_vm0, %v1494_v25  ;;  %v1492_v32 = vld [vmem:[%s3728_s3 + $0x10] sm:$0xff]  ;;  %v789_v25 = vld [vmem:[#allocation2 + $0x80] sm:$0xff] }
 0x142   : > { %1029 = vrot.lane.b32.xlu0 %v917_v63, %s3769_s20 }
 0x143   : > { %1071 = vrot.lane.b32.xlu1 %v2960_v5, %s3740_s14 }
 0x146   : > { %1265 = vrot.lane.b32.xlu0 %v2954_v1, %s3738_s22 }
 0x147   : > { %1307 = vrot.lane.b32.xlu1 %v915_v7, %s3742_s25 }
 0x14a   : > { %985 = vrot.lane.b32.xlu0 %v2954_v1, %s2547_s24  ;;  %v1493_v1 = vld [vmem:[%s3728_s3 + $0x18] sm:$0xff] }
 0x14b   : > { %1027 = vrot.lane.b32.xlu1 %v915_v7, %s3769_s20  ;;  %2309 = vmatprep.subr.mxu1 %v1493_v1 }
 0x14c   : > { %2310 = vmatpush3.msra.mxu1 %v1493_v1  ;;  %v3123_v1 = vld [vmem:[#allocation2 + $0xb0] sm:$0xff] }
 0x14d   : > { %2311 = vmatprep.subr.mxu1 %v1492_v32  ;;  %v929_v46 = vrot.slane %v3123_v1, 1 }
 0x14e   : > { %1213 = vrot.lane.b32.xlu0 %v2978_v14, %s3744_s26  ;;  %2312 = vmatpush3.msra.mxu1 %v1492_v32 }
 0x14f   : > { %1235 = vrot.lane.b32.xlu1 %v948_v12, %s3744_s26 }
 0x152   : > { %1073 = vrot.lane.b32.xlu0 %v2978_v14, %s3740_s14 }
 0x153   : > { %1095 = vrot.lane.b32.xlu1 %v948_v12, %s3740_s14 }
 0x156   : > { %1167 = vrot.lane.b32.xlu0 %v915_v7, %s3736_s13 }
 0x157   : > { %1331 = vrot.lane.b32.xlu1 %v954_v30, %s3742_s25 }
 0x15a   : > { %1237 = vrot.lane.b32.xlu0 %v950_v37, %s3744_s26 }
 0x15b   : > { %1191 = vrot.lane.b32.xlu1 %v954_v30, %s3736_s13 }
 0x15e   : > { %1097 = vrot.lane.b32.xlu0 %v950_v37, %s3740_s14  ;;  %v790_v37 = vld [vmem:[#allocation2 + $0x88] sm:$0xff] }
 0x15f   : > { %1263 = vrot.lane.b32.xlu1 %v786_v22, %s3738_s22 }
 0x162   : > { %973 = vrot.lane.b32.xlu0 %v3003_v42, %s2547_s24 }
 0x163   : > { %1123 = vrot.lane.b32.xlu1 %v786_v22, %s3791_s21 }
 0x164   : > { %v3011_v49 = vpop.permute.xlu0 %1117 }
 0x165   : > { %v3009_v48 = vpop.permute.xlu1 %1141 }
 0x166   : > { %3792 = vst [vmem:[#allocation23_spill] sm:$0xff] %v3009_v48  ;;  %983 = vrot.lane.b32.xlu0 %v786_v22, %s2547_s24  ;;  %v1491_v22 = vld [vmem:[%s3728_s3 + $0x8] sm:$0xff] }
 0x167   : > { %1313 = vrot.lane.b32.xlu1 %v922_v52, %s3742_s25  ;;  %2313 = vmatprep.subr.mxu1 %v1491_v22 }
 0x168   : > { %v3018_v56 = vpop.permute.xlu0 %977  ;;  %2314 = vmatpush3.msra.mxu1 %v1491_v22  ;;  %v858_v22 = vrot.slane %v789_v25, 7 }
 0x169   : > { %v3020_v59 = vpop.permute.xlu1 %975  ;;  %2315 = vmatprep.subr.mxu1 %v1490_v47 }
 0x16a   : > { %1173 = vrot.lane.b32.xlu0 %v922_v52, %s3736_s13  ;;  %2316 = vmatpush3.msra.mxu1 %v1490_v47  ;;  %v859_v47 = vrot.slane %v790_v37, 7  ;;  %s3809_s13 = smov 24  }
 0x16b   : > { %1129 = vrot.lane.b32.xlu1 %v3016_v55, %s3791_s21 }
 0x16c   : > { %v3026_v63 = vpop.permute.xlu0 %1281  ;;  %v3158_v28 = vsel %vm837_vm4, %v859_v47, %v861_v13  ;;  %v794_v13 = vld [vmem:[#allocation2 + $0xa8] sm:$0xff] }
 0x16d   : > { %3793 = vst [vmem:[#allocation24_spill] sm:$0xff] %v3026_v63  ;;  %v3028_v0 = vpop.permute.xlu1 %1279  ;;  %v864_v33 = vrot.slane %v794_v13, 7 }
 0x16e   : > { %3794 = vst [vmem:[#allocation25_spill] sm:$0xff] %v3028_v0  ;;  %1033 = vrot.lane.b32.xlu0 %v922_v52, %s3769_s20  ;;  %v903_v52 = vrot.slane %v3039_v9, 1 }
 0x16f   : > { %1021 = vrot.lane.b32.xlu1 %v907_v2, %s3769_s20  ;;  %v3204_v23 = vsel %vm837_vm4, %v863_v39, %v864_v33 }
 0x170   : > { %v3035_v7 = vpop.permute.xlu0 %1001  ;;  %v905_v2 = vsel %vm902_vm3, %v903_v52, %v904_v58  ;;  %3815 = vst [vmem:[#allocation41_spill] sm:$0xff] %v3204_v23 }
 0x171   : > { %3795 = vst [vmem:[#allocation26_spill] sm:$0xff] %v3035_v7  ;;  %v3037_v8 = vpop.permute.xlu1 %1139 }
 0x172   : > { %3796 = vst [vmem:[#allocation27_spill] sm:$0xff] %v3037_v8  ;;  %971 = vrot.lane.b32.xlu0 %v3039_v9, %s2547_s24  ;;  %v797_v8 = vld [vmem:[#allocation2 + $0xc0] sm:$0xff] }
 0x173   : > { %1215 = vrot.lane.b32.xlu1 %v3042_v10, %s3744_s26 }
 0x174   : > { %v3050_v12 = vpop.permute.xlu0 %1115 }
 0x175   : > { %v3048_v11 = vpop.permute.xlu1 %1329 }
 0x176   : > { %3797 = vst [vmem:[#allocation28_spill] sm:$0xff] %v3048_v11  ;;  %1269 = vrot.lane.b32.xlu0 %v3016_v55, %s3738_s22  ;;  %s3805_s22 = smov 32  }
 0x177   : > { %1075 = vrot.lane.b32.xlu1 %v3042_v10, %s3740_s14  ;;  %s3798_s14 = smov 12  }
 0x178   : > { %v3056_v16 = vpop.permute.xlu0 %999 }
 0x179   : > { %v3058_v18 = vpop.permute.xlu1 %1121 }
 0x17a   : > { %989 = vrot.lane.b32.xlu0 %v3016_v55, %s2547_s24 }
 0x17b   : > { %1311 = vrot.lane.b32.xlu1 %v920_v19, %s3742_s25  ;;  %s3801_s25 = smov 20  }
 0x17c   : > { %v3069_v26 = vpop.permute.xlu0 %1165 }
 0x17d   : > { %v3071_v30 = vpop.permute.xlu1 %1069 }
 0x17e   : > { %1217 = vrot.lane.b32.xlu0 %v3075_v31, %s3744_s26  ;;  %s3799_s26 = smov 28  }
 0x17f   : > { %1031 = vrot.lane.b32.xlu1 %v920_v19, %s3769_s20 }
 0x180   : > { %v3086_v35 = vpop.permute.xlu0 %1025 }
 0x181   : > { %v3088_v36 = vpop.permute.xlu1 %1163 }
 0x182   : > { %1077 = vrot.lane.b32.xlu0 %v3075_v31, %s3798_s14 }
 0x183   : > { %1267 = vrot.lane.b32.xlu1 %v790_v37, %s3799_s26 }
 0x184   : > { %v3096_v41 = vpop.permute.xlu0 %1189 }
 0x185   : > { %3800 = vst [vmem:[#allocation29_spill] sm:$0xff] %v3096_v41  ;;  %v3098_v44 = vpop.permute.xlu1 %1023  ;;  %v811_v41 = vld [vmem:[#allocation2 + $0x130] sm:$0xff] }
 0x186   : > { %1171 = vrot.lane.b32.xlu0 %v920_v19, %s3801_s25 }
 0x187   : > { %1127 = vrot.lane.b32.xlu1 %v790_v37, %s3791_s21 }
 0x188   : > { %v3106_v61 = vpop.permute.xlu0 %1049 }
 0x189   : > { %3802 = vst [vmem:[#allocation30_spill] sm:$0xff] %v3106_v61  ;;  %v3108_v62 = vpop.permute.xlu1 %1231  ;;  %v866_v61 = vrot.slane %v3123_v1, 7 }
 0x18a   : > { %3803 = vst [vmem:[#allocation31_spill] sm:$0xff] %v3108_v62  ;;  %987 = vrot.lane.b32.xlu0 %v790_v37, %s2547_s24  ;;  %v3824_v62 = vrot.slane %v2916_v43, 1  ;;  %v812_v43 = vld [vmem:[#allocation2 + $0x138] sm:$0xff] }
 0x18b   : > { %1019 = vrot.lane.b32.xlu1 %v905_v2, %s3769_s20  ;;  %v3137_v2 = vsel %vm837_vm4, %v858_v22, %v859_v47  ;;  %v796_v47 = vld [vmem:[#allocation2 + $0xb8] sm:$0xff]  ;;  %v3225_v7 = vsel %vm837_vm4, %v864_v33, %v866_v61  ;;  %v1369_v61 = vsel %vm339_vm1, %v2902_v38, %v3056_v16 }
 0x18c   : > { %v3118_v19 = vpop.permute.xlu0 %1261  ;;  %3808 = vst [vmem:[#allocation35_spill] sm:$0xff] %v3137_v2  ;;  %v931_v20 = vrot.slane %v796_v47, 1  ;;  %3816 = vst [vmem:[#allocation42_spill] sm:$0xff] %v3225_v7  ;;  %v800_v33 = vld [vmem:[#allocation2 + $0xd8] sm:$0xff] }
 0x18d   : > { %v3116_v15 = vpop.permute.xlu1 %1091  ;;  %v936_v0 = vrot.slane %v800_v33, 1 }
 0x18e   : > { %3804 = vst [vmem:[#allocation32_spill] sm:$0xff] %v3116_v15  ;;  %1177 = vrot.lane.b32.xlu0 %v927_v21, %s3801_s25 }
 0x18f   : > { %1317 = vrot.lane.b32.xlu1 %v927_v21, %s3805_s22 }
 0x190   : > { %v3127_v32 = vpop.permute.xlu0 %981 }
 0x191   : > { %v3125_v58 = vpop.permute.xlu1 %1327 }
 0x192   : > { %3806 = vst [vmem:[#allocation33_spill] sm:$0xff] %v3125_v58  ;;  %1037 = vrot.lane.b32.xlu0 %v927_v21, %s3769_s20  ;;  %v923_v21 = vrot.slane %v790_v37, 1 }
 0x193   : > { %1133 = vrot.lane.b32.xlu1 %v3123_v1, %s3791_s21 }
 0x194   : > { %v3134_v53 = vpop.permute.xlu0 %1285  ;;  %v925_v34 = vsel %vm902_vm3, %v923_v21, %v924_v3 }
 0x195   : > { %v3132_v52 = vpop.permute.xlu1 %1047  ;;  %3807 = vst [vmem:[#allocation34_spill] sm:$0xff] %v3134_v53 }
 0x196   : > { %1273 = vrot.lane.b32.xlu0 %v3123_v1, %s3799_s26 }
 0x197   : > { %1219 = vrot.lane.b32.xlu1 %v3137_v2, %s3809_s13 }
 0x198   : > { %v3143_v6 = vpop.permute.xlu0 %1145 }
 0x199   : > { %3810 = vst [vmem:[#allocation36_spill] sm:$0xff] %v3143_v6  ;;  %v3145_v25 = vpop.permute.xlu1 %1259 }
 0x19a   : > { %993 = vrot.lane.b32.xlu0 %v3123_v1, %s2547_s24 }
 0x19b   : > { %1079 = vrot.lane.b32.xlu1 %v3137_v2, %s3798_s14 }
 0x19c   : > { %v3152_v22 = vpop.permute.xlu0 %1067 }
 0x19d   : > { %v3154_v40 = vpop.permute.xlu1 %1119 }
 0x19e   : > { %1221 = vrot.lane.b32.xlu0 %v3158_v28, %s3809_s13 }
 0x19f   : > { %1315 = vrot.lane.b32.xlu1 %v925_v34, %s3805_s22 }
 0x1a0   : > { %v3163_v55 = vpop.permute.xlu0 %1233 }
 0x1a1   : > { %3811 = vst [vmem:[#allocation37_spill] sm:$0xff] %v3163_v55  ;;  %v3165_v37 = vpop.permute.xlu1 %1283 }
 0x1a2   : > { %3812 = vst [vmem:[#allocation38_spill] sm:$0xff] %v3165_v37  ;;  %1081 = vrot.lane.b32.xlu0 %v3158_v28, %s3798_s14 }
 0x1a3   : > { %1035 = vrot.lane.b32.xlu1 %v925_v34, %s3769_s20 }
 0x1a4   : > { %v3170_v24 = vpop.permute.xlu0 %1093 }
 0x1a5   : > { %3813 = vst [vmem:[#allocation39_spill] sm:$0xff] %v3170_v24  ;;  %v3172_v3 = vpop.permute.xlu1 %1143  ;;  %v963_v24 = vrot.slane %v811_v41, 7 }
 0x1a6   : > { %1175 = vrot.lane.b32.xlu0 %v925_v34, %s3801_s25  ;;  %v932_v34 = vsel %vm902_vm3, %v929_v46, %v931_v20 }
 0x1a7   : > { %1271 = vrot.lane.b32.xlu1 %v794_v13, %s3799_s26 }
 0x1a8   : > { %v3176_v21 = vpop.permute.xlu0 %1187 }
 0x1a9   : > { %3814 = vst [vmem:[#allocation40_spill] sm:$0xff] %v3176_v21  ;;  %v3178_v50 = vpop.permute.xlu1 %1309 }
 0x1aa   : > { %991 = vrot.lane.b32.xlu0 %v794_v13, %s2547_s24 }
 0x1ab   : > { %1131 = vrot.lane.b32.xlu1 %v794_v13, %s3791_s21 }
 0x1ac   : > { %v3183_v17 = vpop.permute.xlu0 %979 }
 0x1ad   : > { %v3185_v4 = vpop.permute.xlu1 %1125 }
 0x1ae   : > { %1181 = vrot.lane.b32.xlu0 %v932_v34, %s3801_s25 }
 0x1af   : > { %1321 = vrot.lane.b32.xlu1 %v932_v34, %s3805_s22 }
 0x1b0   : > { %v3192_v45 = vpop.permute.xlu0 %1169 }
 0x1b1   : > { %v3194_v47 = vpop.permute.xlu1 %1211 }
 0x1b2   : > { %1041 = vrot.lane.b32.xlu0 %v932_v34, %s3769_s20  ;;  %v928_v34 = vrot.slane %v794_v13, 1 }
 0x1b3   : > { %1137 = vrot.lane.b32.xlu1 %v3190_v51, %s3791_s21 }
 0x1b4   : > { %v3199_v27 = vpop.permute.xlu0 %1029  ;;  %v930_v57 = vsel %vm902_vm3, %v928_v34, %v929_v46  ;;  %v798_v46 = vld [vmem:[#allocation2 + $0xc8] sm:$0xff]  ;;  %v1386_v34 = vsel %vm1371_vm5, %v1369_v61, %v3132_v52 }
 0x1b5   : > { %v3201_v20 = vpop.permute.xlu1 %1071  ;;  %v869_v33 = vrot.slane %v798_v46, 7 }
 0x1b6   : > { %1277 = vrot.lane.b32.xlu0 %v3190_v51, %s3799_s26 }
 0x1b7   : > { %1223 = vrot.lane.b32.xlu1 %v3204_v23, %s3809_s13 }
 0x1b8   : > { %v3212_v6 = vpop.permute.xlu0 %1265 }
 0x1b9   : > { %v3210_v60 = vpop.permute.xlu1 %1307 }
 0x1ba   : > { %997 = vrot.lane.b32.xlu0 %v3190_v51, %s2547_s24 }
 0x1bb   : > { %1083 = vrot.lane.b32.xlu1 %v3204_v23, %s3798_s14 }
 0x1bc   : > { %v3221_v53 = vpop.permute.xlu0 %985 }
 0x1bd   : > { %v3219_v39 = vpop.permute.xlu1 %1027 }
 0x1be   : > { %1225 = vrot.lane.b32.xlu0 %v3225_v7, %s3809_s13 }
 0x1bf   : > { %1319 = vrot.lane.b32.xlu1 %v930_v57, %s3805_s22 }
 0x1c0   : > { %v3232_v13 = vpop.permute.xlu0 %1213 }
 0x1c1   : > { %v3230_v1 = vpop.permute.xlu1 %1235 }
 0x1c2   : > { %3817 = vst [vmem:[#allocation43_spill] sm:$0xff] %v3230_v1  ;;  %1085 = vrot.lane.b32.xlu0 %v3225_v7, %s3798_s14 }
 0x1c3   : > { %1039 = vrot.lane.b32.xlu1 %v930_v57, %s3769_s20 }
 0x1c4   : > { %v3237_v11 = vpop.permute.xlu0 %1073 }
 0x1c5   : > { %v1096_v37 = vpop.permute.xlu1 %1095 }
 0x1c6   : > { %1179 = vrot.lane.b32.xlu0 %v930_v57, %s3801_s25  ;;  %v1403_v21 = vsel %vm1388_vm6, %v1386_v34, %v1096_v37  ;;  %v934_v57 = vrot.slane %v3190_v51, 1  ;;  %v868_v34 = vrot.slane %v797_v8, 7 }
 0x1c7   : > { %1275 = vrot.lane.b32.xlu1 %v798_v46, %s3799_s26  ;;  %v1420_v38 = vsel %vm1405_vm7, %v1403_v21, %v3172_v3  ;;  %v871_v21 = vrot.slane %v3190_v51, 7 }
 0x1c8   : > { %v3248_v58 = vpop.permute.xlu0 %1167  ;;  %v937_v37 = vsel %vm902_vm3, %v934_v57, %v936_v0  ;;  %v3269_v3 = vsel %vm837_vm4, %v868_v34, %v869_v33 }
 0x1c9   : > { %v3246_v1 = vpop.permute.xlu1 %1331  ;;  %3822 = vst [vmem:[#allocation48_spill] sm:$0xff] %v3269_v3 }
 0x1ca   : > { %3818 = vst [vmem:[#allocation44_spill] sm:$0xff] %v3246_v1  ;;  %995 = vrot.lane.b32.xlu0 %v798_v46, %s2547_s24 }
 0x1cb   : > { %1135 = vrot.lane.b32.xlu1 %v798_v46, %s3791_s21 }
 0x1cc   : > { %v3256_v52 = vpop.permute.xlu0 %1237 }
 0x1cd   : > { %v1192_v16 = vpop.permute.xlu1 %1191  ;;  %3819 = vst [vmem:[#allocation45_spill] sm:$0xff] %v3256_v52  ;;  %v810_v52 = vld [vmem:[#allocation2 + $0x128] sm:$0xff] }
 0x1ce   : > { %v3259_v61 = vsel %vm1422_vm8, %v1420_v38, %v1192_v16  ;;  %1185 = vrot.lane.b32.xlu0 %v937_v37, %s3801_s25  ;;  %v3278_v38 = vsel %vm837_vm4, %v869_v33, %v871_v21  ;;  %v933_v16 = vrot.slane %v798_v46, 1  ;;  %v961_v48 = vrot.slane %v810_v52, 7 }
 0x1cf   : > { %3820 = vst [vmem:[#allocation46_spill] sm:$0xff] %v3259_v61  ;;  %1325 = vrot.lane.b32.xlu1 %v937_v37, %s3805_s22  ;;  %3823 = vst [vmem:[#allocation49_spill] sm:$0xff] %v3278_v38  ;;  %v808_v61 = vld [vmem:[#allocation2 + $0x118] sm:$0xff] }
 0x1d0   : > { %v3264_v1 = vpop.permute.xlu0 %1097  ;;  %v955_v21 = vrot.slane %v808_v61, 1 }
 0x1d1   : > { %3821 = vst [vmem:[#allocation47_spill] sm:$0xff] %v3264_v1  ;;  %v3266_v63 = vpop.permute.xlu1 %1263  ;;  %v809_v1 = vld [vmem:[#allocation2 + $0x120] sm:$0xff] }
 0x1d2   : > { %1045 = vrot.lane.b32.xlu0 %v937_v37, %s3769_s20  ;;  %v935_v37 = vsel %vm902_vm3, %v933_v16, %v934_v57  ;;  %v1362_v57 = vsel %vm339_vm1, %v3075_v31, %v3221_v53  ;;  %v956_v55 = vsel %vm902_vm3, %v3824_v62, %v955_v21  ;;  %v960_v61 = vrot.slane %v809_v1, 7 }
 0x1d3   : > { %1227 = vrot.lane.b32.xlu1 %v3269_v3, %s3809_s13  ;;  %v964_v53 = vsel %vm837_vm4, %v961_v48, %v963_v24  ;;  %v966_v21 = vrot.slane %v810_v52, 1  ;;  %v839_v24 = vrot.slane %v3039_v9, 7 }
 0x1d4   : > { %v974_v0 = vpop.permute.xlu0 %973  ;;  %v962_v31 = vsel %vm837_vm4, %v960_v61, %v961_v48 }
 0x1d5   : > { %v3275_v8 = vpop.permute.xlu1 %1123 }
 0x1d6   : > { %1229 = vrot.lane.b32.xlu0 %v3278_v38, %s3809_s13 }
 0x1d7   : > { %1087 = vrot.lane.b32.xlu1 %v3269_v3, %s3798_s14 }
 0x1d8   : > { %v3284_v34 = vpop.permute.xlu0 %983 }
 0x1d9   : > { %v3286_v51 = vpop.permute.xlu1 %1313 }
 0x1da   : > { %1089 = vrot.lane.b32.xlu0 %v3278_v38, %s3798_s14 }
 0x1db   : > { %1323 = vrot.lane.b32.xlu1 %v935_v37, %s3805_s22 }
 0x1dc   : > { %v3292_v33 = vpop.permute.xlu0 %1173 }
 0x1dd   : > { %v3294_v46 = vpop.permute.xlu1 %1129 }
 0x1de   : > { %1183 = vrot.lane.b32.xlu0 %v935_v37, %s3801_s25 }
 0x1df   : > { %1043 = vrot.lane.b32.xlu1 %v935_v37, %s3769_s20 }
 0x1e0   : > { %v1034_v16 = vpop.permute.xlu0 %1033 }
 0x1e1   : > { %v1022_v15 = vpop.permute.xlu1 %1021  ;;  %v3305_v3 = vsel %vm1371_vm5, %v1362_v57, %v1034_v16  ;;  %v967_v57 = vrot.slane %v811_v41, 1  ;;  %v969_v16 = vrot.slane %v812_v43, 1 }
 0x1e2   : > { %1333 = vrot.lane.b32.xlu0 %v956_v55, %s3805_s22 }
 0x1e3   : > { %1193 = vrot.lane.b32.xlu1 %v956_v55, %s3801_s25  ;;  %v841_v55 = vrot.slane %v3003_v42, 7  ;;  %s2206_s25 = sshll.u32 %s2531_s9, 5 }
 0x1e4   : > { %v972_v37 = vpop.permute.xlu0 %971 }
 0x1e5   : > { %v1216_v23 = vpop.permute.xlu1 %1215 }
 0x1e6   : > { %1239 = vrot.lane.b32.xlu0 %v962_v31, %s3809_s13  ;;  %v968_v31 = vsel %vm902_vm3, %v966_v21, %v967_v57  ;;  %v773_v21 = vld [vmem:[#allocation2] sm:$0xff] }
 0x1e7   : > { %1241 = vrot.lane.b32.xlu1 %v964_v53, %s3809_s13  ;;  %v970_v53 = vsel %vm902_vm3, %v967_v57, %v969_v16  ;;  %s310_s13 = sand.u32 1, %s2519_s28  }
 0x1e8   : > { %v3315_v1 = vpop.permute.xlu0 %1269 }
 0x1e9   : > { %v3313_v62 = vpop.permute.xlu1 %1075 }
 0x1ea   : > { %1287 = vrot.lane.b32.xlu0 %v810_v52, %s3799_s26  ;;  %v2158_v52 = vld [vmem:[%s3732_s7] ss:$0 sm:$0xff] }
 0x1eb   : > { %1289 = vrot.lane.b32.xlu1 %v811_v41, %s3799_s26  ;;  %v842_v41 = vsel %vm837_vm4, %v839_v24, %v841_v55 }
 0x1ec   : > { %v990_v61 = vpop.permute.xlu0 %989  ;;  %v1356_v9 = vsel %vm339_vm1, %v842_v41, %v974_v0  ;;  %v1357_v0 = vsel %vm339_vm1, %v2933_v54, %v3020_v59 }
 0x1ed   : > { %v1312_v48 = vpop.permute.xlu1 %1311  ;;  %v1373_v7 = vsel %vm1371_vm5, %v1356_v9, %v1022_v15  ;;  %v1358_v15 = vsel %vm339_vm1, %v2887_v29, %v3018_v56 }
 0x1ee   : > { %1335 = vrot.lane.b32.xlu0 %v968_v31, %s3805_s22  ;;  %v1390_v31 = vsel %vm1388_vm6, %v1373_v7, %v3071_v30  ;;  %v1374_v30 = vsel %vm1371_vm5, %v1357_v0, %v3098_v44 }
 0x1ef   : > { %1337 = vrot.lane.b32.xlu1 %v970_v53, %s3805_s22  ;;  %v838_v53 = vrot.slane %v773_v21, 7  ;;  %v1407_v55 = vsel %vm1405_vm7, %v1390_v31, %v3011_v49  ;;  %v1391_v29 = vsel %vm1388_vm6, %v1374_v30, %v3201_v20 }
 0x1f0   : > { %v1218_v42 = vpop.permute.xlu0 %1217  ;;  %v1424_v41 = vsel %vm1422_vm8, %v1407_v55, %v3069_v26  ;;  %v1408_v20 = vsel %vm1405_vm7, %v1391_v29, %v3154_v40 }
 0x1f1   : > { %v3329_v43 = vpop.permute.xlu1 %1031  ;;  %v840_v7 = vsel %vm837_vm4, %v838_v53, %v839_v24  ;;  %v1425_v24 = vsel %vm1422_vm8, %v1408_v20, %v3248_v58 }
 0x1f2   : > { %582 = vrot.lane.b32.xlu0 %v2158_v52, %s2547_s24  ;;  %v1375_v52 = vsel %vm1371_vm5, %v1358_v15, %v3086_v35  ;;  %v1355_v54 = vsel %vm339_vm1, %v840_v7, %v972_v37  ;;  %v1442_v21 = vsel %vm1439_vm9, %v1425_v24, %v1216_v23  ;;  %s2135_s24 = sshll.u32 %s310_s13, 7 }
 0x1f3   : > { %v1392_v49 = vsel %vm1388_vm6, %v1375_v52, %v3237_v11  ;;  %v1441_v11 = vsel %vm1439_vm9, %v1424_v41, %v3232_v13  ;;  %v1459_v23 = vsel %vm1456_vm10, %v1442_v21, %v3266_v63  ;;  %s3614_s26 = scalar_lea.vmem [#allocation3], %s2135_s24 }
 0x1f4   : > { %v1078_v57 = vpop.permute.xlu0 %1077  ;;  %v1409_v44 = vsel %vm1405_vm7, %v1392_v49, %v3058_v18  ;;  %s2048_s21 = sshll.u32 %s3614_s26, 4  ;;  %s3660_s21 = int_to_ptr.vmem [resolvable:$true] %s2048_s21 }
 0x1f5   : > { %v3334_v16 = vpop.permute.xlu1 %1267 }
 0x1f8   : > { %v1172_v38 = vpop.permute.xlu0 %1171 }
 0x1f9   : > { %v3340_v2 = vpop.permute.xlu1 %1127 }
 0x1fc   : > { %v3360_v56 = vpop.permute.xlu0 %987 }
 0x1fd   : > { %v1020_v59 = vpop.permute.xlu1 %1019 }
 0x1fe   : > { %v1372_v35 = vsel %vm1371_vm5, %v1355_v54, %v1020_v59 }
 0x1ff   : > { %v1389_v26 = vsel %vm1388_vm6, %v1372_v35, %v3152_v22  ;;  %v1426_v22 = vsel %vm1422_vm8, %v1409_v44, %v3192_v45  ;;  %v1364_v45 = vsel %vm339_vm1, %v3158_v28, %v990_v61  ;;  %v1359_v28 = vsel %vm339_vm1, %v2960_v5, %v3183_v17 }
 0x200   : > { %v1406_v37 = vsel %vm1405_vm7, %v1389_v26, %v3050_v12  ;;  %v3377_v9 = vpop.permute.xlu0 %1177  ;;  %v1458_v12 = vsel %vm1456_vm10, %v1441_v11, %v3118_v19  ;;  %v1443_v58 = vsel %vm1439_vm9, %v1426_v22, %v1218_v42  ;;  %v1476_v42 = vsel %vm1473_vm11, %v1459_v23, %v1312_v48 }
 0x201   : > { %v1423_v18 = vsel %vm1422_vm8, %v1406_v37, %v3088_v36  ;;  %v1318_v13 = vpop.permute.xlu1 %1317  ;;  %v1475_v19 = vsel %vm1473_vm11, %v1458_v12, %v3178_v50  ;;  %v1376_v63 = vsel %vm1371_vm5, %v1359_v28, %v3219_v39  ;;  %v1360_v50 = vsel %vm339_vm1, %v2978_v14, %v3127_v32 }
 0x202   : > { %v1440_v40 = vsel %vm1439_vm9, %v1423_v18, %v3194_v47  ;;  %v1377_v17 = vsel %vm1371_vm5, %v1360_v50, %v3199_v27  ;;  %v1361_v26 = vsel %vm339_vm1, %v3042_v10, %v3284_v34  ;;  %v3825_v50 = vld [vmem:[#allocation35_spill] sm:$0xff] }
 0x203   : > { %v1457_v36 = vsel %vm1456_vm10, %v1440_v40, %v3145_v25  ;;  %v1460_v25 = vsel %vm1456_vm10, %v1443_v58, %v3212_v6  ;;  %v1393_v6 = vsel %vm1388_vm6, %v1376_v63, %v3313_v62  ;;  %v1394_v5 = vsel %vm1388_vm6, %v1377_v17, %v1078_v57 }
 0x204   : > { %v1474_v31 = vsel %vm1473_vm11, %v1457_v36, %v3210_v60  ;;  %v1038_v53 = vpop.permute.xlu0 %1037  ;;  %v1477_v55 = vsel %vm1473_vm11, %v1460_v25, %v3286_v51  ;;  %v1410_v39 = vsel %vm1405_vm7, %v1393_v6, %v3275_v8  ;;  %v1411_v62 = vsel %vm1405_vm7, %v1394_v5, %v3185_v4  ;;  %v3826_v5 = vld [vmem:[#allocation49_spill] sm:$0xff] }
 0x205   : > { %2317 = vmatprep.mubr.msk.f32.mxu1 %vm1502_vm12, %v1474_v31  ;;  %v3396_v47 = vpop.permute.xlu1 %1133  ;;  %v3404_v60 = vsel %vm1371_vm5, %v1364_v45, %v1038_v53  ;;  %v1427_v14 = vsel %vm1422_vm8, %v1410_v39, %v1172_v38  ;;  %v1428_v57 = vsel %vm1422_vm8, %v1411_v62, %v3292_v33  ;;  %v1378_v20 = vsel %vm1371_vm5, %v1361_v26, %v3329_v43 }
 0x206   : > { %2318 = vmatmul.mubr.msk.f32.vlgmr.msra.gmra.mxu1 %vm1502_vm12, %v1475_v19  ;;  %v1363_v6 = vsel %vm339_vm1, %v3825_v50, %v3360_v56  ;;  %v3841_v50 = vld [vmem:[#allocation45_spill] sm:$0xff] }
 0x207   : > { %2320 = vmatprep.mubr.msk.f32.mxu1 %vm1502_vm12, %v1476_v42 }
 0x208   : > { %v1274_v61 = vpop.permute.xlu0 %1273 }
 0x209   : > { %v1220_v48 = vpop.permute.xlu1 %1219 }
 0x20a   : > { %2321 = vmatmul.mubr.msk.f32.gmra.mxu1 %vm1502_vm12, %v1477_v55  ;;  %v1444_v51 = vsel %vm1439_vm9, %v1427_v14, %v1220_v48 }
 0x20b   : > { %v1461_v27 = vsel %vm1456_vm10, %v1444_v51, %v3334_v16 }
 0x20c   : > { %v3427_v15 = vpop.permute.xlu0 %993 }
 0x20d   : > { %v1080_v32 = vpop.permute.xlu1 %1079 }
 0x210   : > { %v1222_v52 = vpop.permute.xlu0 %1221 }
 0x211   : > { %v1316_v0 = vpop.permute.xlu1 %1315  ;;  %v1445_v38 = vsel %vm1439_vm9, %v1428_v57, %v1222_v52  ;;  %v3828_v52 = vld [vmem:[#allocation41_spill] sm:$0xff] }
 0x212   : > { %v1478_v8 = vsel %vm1473_vm11, %v1461_v27, %v1316_v0  ;;  %v1462_v7 = vsel %vm1456_vm10, %v1445_v38, %v3315_v1  ;;  %v3827_v0 = vld [vmem:[#allocation42_spill] sm:$0xff] }
 0x213   : > { %2323 = vmatprep.mubr.msk.f32.mxu1 %vm1502_vm12, %v1478_v8  ;;  %v1479_v4 = vsel %vm1473_vm11, %v1462_v7, %v1318_v13  ;;  %v1366_v57 = vsel %vm339_vm1, %v3827_v0, %v3427_v15 }
 0x214   : > { %2324 = vmatmul.mubr.msk.f32.gmra.mxu1 %vm1502_vm12, %v1479_v4  ;;  %v1082_v16 = vpop.permute.xlu0 %1081 }
 0x215   : > { %v1036_v30 = vpop.permute.xlu1 %1035  ;;  %v1396_v49 = vsel %vm1388_vm6, %v3305_v3, %v1082_v16  ;;  %v1395_v3 = vsel %vm1388_vm6, %v1378_v20, %v1080_v32 }
 0x216   : > { %v1413_v33 = vsel %vm1405_vm7, %v1396_v49, %v3294_v46  ;;  %v1412_v46 = vsel %vm1405_vm7, %v1395_v3, %v3340_v2  ;;  %v1380_v48 = vsel %vm1371_vm5, %v1363_v6, %v1036_v30  ;;  %v3829_v30 = vld [vmem:[#allocation39_spill] sm:$0xff]  ;;  %v3831_v3 = vld [vmem:[#allocation48_spill] sm:$0xff] }
 0x217   : > { %v1430_v10 = vsel %vm1422_vm8, %v1413_v33, %v3377_v9 }
 0x218   : > { %v1176_v41 = vpop.permute.xlu0 %1175 }
 0x219   : > { %v1272_v29 = vpop.permute.xlu1 %1271  ;;  %v1429_v18 = vsel %vm1422_vm8, %v1412_v46, %v1176_v41 }
 0x21c   : > { %v992_v54 = vpop.permute.xlu0 %991 }
 0x21d   : > { %v1132_v59 = vpop.permute.xlu1 %1131  ;;  %v1365_v8 = vsel %vm339_vm1, %v3828_v52, %v992_v54 }
 0x220   : > { %v1182_v35 = vpop.permute.xlu0 %1181 }
 0x221   : > { %v1322_v1 = vpop.permute.xlu1 %1321 }
 0x224   : > { %v1042_v44 = vpop.permute.xlu0 %1041 }
 0x225   : > { %v1138_v11 = vpop.permute.xlu1 %1137  ;;  %v1383_v7 = vsel %vm1371_vm5, %v1366_v57, %v1042_v44  ;;  %v3830_v44 = vld [vmem:[#allocation23_spill] sm:$0xff]  ;;  %v3849_v57 = vld [vmem:[#allocation30_spill] sm:$0xff] }
 0x228   : > { %v1278_v24 = vpop.permute.xlu0 %1277 }
 0x229   : > { %v1224_v37 = vpop.permute.xlu1 %1223 }
 0x22a   : > { %v1446_v22 = vsel %vm1439_vm9, %v1429_v18, %v1224_v37  ;;  %v3832_v18 = vld [vmem:[#allocation37_spill] sm:$0xff] }
 0x22b   : > { %v1463_v40 = vsel %vm1456_vm10, %v1446_v22, %v1272_v29 }
 0x22c   : > { %v998_v21 = vpop.permute.xlu0 %997 }
 0x22d   : > { %v1084_v13 = vpop.permute.xlu1 %1083 }
 0x230   : > { %v1226_v34 = vpop.permute.xlu0 %1225 }
 0x231   : > { %v1320_v12 = vpop.permute.xlu1 %1319  ;;  %v1447_v58 = vsel %vm1439_vm9, %v1430_v10, %v1226_v34  ;;  %v3834_v10 = vld [vmem:[#allocation32_spill] sm:$0xff] }
 0x232   : > { %v1480_v43 = vsel %vm1473_vm11, %v1463_v40, %v1320_v12  ;;  %v1464_v36 = vsel %vm1456_vm10, %v1447_v58, %v1274_v61  ;;  %v1397_v61 = vsel %vm1388_vm6, %v1380_v48, %v1084_v13  ;;  %v3833_v40 = vld [vmem:[#allocation31_spill] sm:$0xff]  ;;  %v3842_v48 = vld [vmem:[#allocation28_spill] sm:$0xff] }
 0x233   : > { %2326 = vmatprep.mubr.msk.f32.mxu1 %vm1502_vm12, %v1480_v43  ;;  %v1481_v2 = vsel %vm1473_vm11, %v1464_v36, %v1322_v1  ;;  %v1715_v1 = vld [vmem:[%s3730_s5] sm:$0xf]  ;;  %v3835_v43 = vld [vmem:[#allocation29_spill] sm:$0xff]  ;;  %v3836_v36 = vld [vmem:[#allocation24_spill] sm:$0xff] }
 0x234   : > { %2327 = vmatmul.mubr.msk.f32.gmra.mxu1 %vm1502_vm12, %v1481_v2  ;;  %v1086_v23 = vpop.permute.xlu0 %1085  ;;  %2341 = vmatprep.subr.msk.mxu0 %vm388_vm0, %v1715_v1 }
 0x235   : > { %v1040_v31 = vpop.permute.xlu1 %1039  ;;  %v1398_v45 = vsel %vm1388_vm6, %v3404_v60, %v1086_v23  ;;  %v1414_v60 = vsel %vm1405_vm7, %v1397_v61, %v1132_v59  ;;  %2342 = vmatpush3.msk.msra.mxu0 %vm388_vm0, %v1715_v1 }
 0x236   : > { %v1415_v9 = vsel %vm1405_vm7, %v1398_v45, %v3396_v47  ;;  %v1368_v47 = vsel %vm339_vm1, %v3826_v5, %v998_v21  ;;  %v1382_v4 = vsel %vm1371_vm5, %v1365_v8, %v1040_v31  ;;  %v3837_v31 = vld [vmem:[#allocation27_spill] sm:$0xff]  ;;  %v3838_v45 = vld [vmem:[#allocation25_spill] sm:$0xff] }
 0x237   : > { %v1432_v14 = vsel %vm1422_vm8, %v1415_v9, %v1182_v35 }
 0x238   : > { %v1180_v53 = vpop.permute.xlu0 %1179 }
 0x239   : > { %v1276_v19 = vpop.permute.xlu1 %1275  ;;  %v1431_v39 = vsel %vm1422_vm8, %v1414_v60, %v1180_v53  ;;  %v3839_v53 = vld [vmem:[#allocation40_spill] sm:$0xff]  ;;  %v3844_v60 = vld [vmem:[#allocation38_spill] sm:$0xff] }
 0x23c   : > { %v996_v42 = vpop.permute.xlu0 %995 }
 0x23d   : > { %v1136_v25 = vpop.permute.xlu1 %1135 }
 0x240   : > { %v1186_v28 = vpop.permute.xlu0 %1185 }
 0x241   : > { %v1326_v63 = vpop.permute.xlu1 %1325 }
 0x244   : > { %v1046_v55 = vpop.permute.xlu0 %1045 }
 0x245   : > { %v1228_v17 = vpop.permute.xlu1 %1227  ;;  %v1385_v51 = vsel %vm1371_vm5, %v1368_v47, %v1046_v55  ;;  %v3843_v55 = vld [vmem:[#allocation43_spill] sm:$0xff]  ;;  %v3845_v47 = vld [vmem:[#allocation44_spill] sm:$0xff] }
 0x246   : > { %v1448_v56 = vsel %vm1439_vm9, %v1431_v39, %v1228_v17  ;;  %v1402_v16 = vsel %vm1388_vm6, %v1385_v51, %v3829_v30  ;;  %v3848_v51 = vld [vmem:[#allocation34_spill] sm:$0xff] }
 0x247   : > { %v1465_v33 = vsel %vm1456_vm10, %v1448_v56, %v1276_v19  ;;  %v1419_v26 = vsel %vm1405_vm7, %v1402_v16, %v3830_v44  ;;  %v3851_v16 = vld [vmem:[#allocation36_spill] sm:$0xff] }
 0x248   : > { %v1230_v32 = vpop.permute.xlu0 %1229  ;;  %v1436_v58 = vsel %vm1422_vm8, %v1419_v26, %v3835_v43 }
 0x249   : > { %v1088_v62 = vpop.permute.xlu1 %1087  ;;  %v1449_v27 = vsel %vm1439_vm9, %v1432_v14, %v1230_v32  ;;  %v1453_v6 = vsel %vm1439_vm9, %v1436_v58, %v3841_v50  ;;  %v3846_v14 = vld [vmem:[#allocation26_spill] sm:$0xff]  ;;  %v3860_v58 = vld [vmem:[#allocation17_spill] sm:$0xff] }
 0x24a   : > { %v1466_v38 = vsel %vm1456_vm10, %v1449_v27, %v1278_v24  ;;  %v1399_v29 = vsel %vm1388_vm6, %v1382_v4, %v1088_v62  ;;  %v3847_v32 = vld [vmem:[#allocation22_spill] sm:$0xff]  ;;  %v1470_v56 = vsel %vm1456_vm10, %v1453_v6, %v3848_v51  ;;  %v3867_v6 = vld [vmem:[#allocation11_spill] sm:$0xff] }
 0x24b   : > { %v1483_v35 = vsel %vm1473_vm11, %v1466_v38, %v1326_v63  ;;  %v1416_v24 = vsel %vm1405_vm7, %v1399_v29, %v1136_v25  ;;  %v1370_v62 = vsel %vm339_vm1, %v3847_v32, %v3846_v14  ;;  %v3850_v38 = vld [vmem:[#allocation47_spill] sm:$0xff] }
 0x24c   : > { %v1090_v49 = vpop.permute.xlu0 %1089  ;;  %v1387_v52 = vsel %vm1371_vm5, %v1370_v62, %v3849_v57 }
 0x24d   : > { %v1324_v41 = vpop.permute.xlu1 %1323  ;;  %v1400_v15 = vsel %vm1388_vm6, %v1383_v7, %v1090_v49  ;;  %v1404_v7 = vsel %vm1388_vm6, %v1387_v52, %v3850_v38 }
 0x24e   : > { %v1482_v59 = vsel %vm1473_vm11, %v1465_v33, %v1324_v41  ;;  %v1417_v54 = vsel %vm1405_vm7, %v1400_v15, %v1138_v11  ;;  %v1367_v11 = vsel %vm339_vm1, %v3831_v3, %v996_v42  ;;  %v1421_v49 = vsel %vm1405_vm7, %v1404_v7, %v3851_v16  ;;  %v3852_v41 = vld [vmem:[#allocation46_spill] sm:$0xff] }
 0x24f   : > { %2329 = vmatprep.mubr.msk.f32.mxu1 %vm1502_vm12, %v1482_v59  ;;  %v1434_v20 = vsel %vm1422_vm8, %v1417_v54, %v1186_v28  ;;  %v3840_v28 = vld [vmem:[#allocation33_spill] sm:$0xff]  ;;  %v3853_v3 = vld [vmem:[#allocation6_spill] sm:$0xff] }
 0x250   : > { %2330 = vmatmul.mubr.msk.f32.gmra.mxu1 %vm1502_vm12, %v1483_v35  ;;  %v1184_v37 = vpop.permute.xlu0 %1183  ;;  %v1451_v13 = vsel %vm1439_vm9, %v1434_v20, %v3832_v18 }
 0x251   : > { %v1044_v46 = vpop.permute.xlu1 %1043  ;;  %v1433_v21 = vsel %vm1422_vm8, %v1416_v24, %v1184_v37  ;;  %v1468_v2 = vsel %vm1456_vm10, %v1451_v13, %v3836_v36  ;;  %v3854_v37 = vld [vmem:[#allocation8_spill] sm:$0xff] }
 0x252   : > { %v1384_v22 = vsel %vm1371_vm5, %v1367_v11, %v1044_v46  ;;  %v1450_v12 = vsel %vm1439_vm9, %v1433_v21, %v3833_v40  ;;  %v1485_v61 = vsel %vm1473_vm11, %v1468_v2, %v3842_v48  ;;  %v3855_v46 = vld [vmem:[#allocation10_spill] sm:$0xff]  ;;  %v3856_v13 = vld [vmem:[#allocation12_spill] sm:$0xff] }
 0x253   : > { %v1401_v34 = vsel %vm1388_vm6, %v1384_v22, %v3834_v10  ;;  %v1467_v9 = vsel %vm1456_vm10, %v1450_v12, %v3838_v45  ;;  %v3857_v22 = vld [vmem:[#allocation14_spill] sm:$0xff]  ;;  %v3858_v12 = vld [vmem:[#allocation15_spill] sm:$0xff] }
 0x254   : > { %v1418_v23 = vsel %vm1405_vm7, %v1401_v34, %v3837_v31  ;;  %v1334_v42 = vpop.permute.xlu0 %1333  ;;  %v1484_v63 = vsel %vm1473_vm11, %v1467_v9, %v3840_v28  ;;  %v3859_v34 = vld [vmem:[#allocation16_spill] sm:$0xff]  ;;  %v3861_v2 = vld [vmem:[#allocation18_spill] sm:$0xff] }
 0x255   : > { %v1435_v19 = vsel %vm1422_vm8, %v1418_v23, %v3839_v53  ;;  %v1194_v25 = vpop.permute.xlu1 %1193  ;;  %2332 = vmatprep.mubr.msk.f32.mxu1 %vm1502_vm12, %v1484_v63  ;;  %v1487_v8 = vsel %vm1473_vm11, %v1470_v56, %v1334_v42  ;;  %v3862_v23 = vld [vmem:[#allocation19_spill] sm:$0xff]  ;;  %v3863_v9 = vld [vmem:[#allocation20_spill] sm:$0xff]  ;;  %v3866_v63 = vld [vmem:[#allocation9_spill] sm:$0xff] }
 0x256   : > { %v1452_v17 = vsel %vm1439_vm9, %v1435_v19, %v3843_v55  ;;  %2333 = vmatmul.mubr.msk.f32.gmra.mxu1 %vm1502_vm12, %v1485_v61  ;;  %v1438_v33 = vsel %vm1422_vm8, %v1421_v49, %v1194_v25  ;;  %v3864_v19 = vld [vmem:[#allocation21_spill] sm:$0xff]  ;;  %v3865_v25 = vld [vmem:[#allocation7_spill] sm:$0xff] }
 0x257   : > { %v1469_v5 = vsel %vm1456_vm10, %v1452_v17, %v3844_v60  ;;  %v3868_v61 = vld [vmem:[#allocation13_spill] sm:$0xff]  ;;  %v2167_v17 = vld [vmem:[%s3729_s4] ss:$0 sm:$0xff] }
 0x258   : > { %v1486_v39 = vsel %vm1473_vm11, %v1469_v5, %v3845_v47  ;;  %v1240_v27 = vpop.permute.xlu0 %1239 }
 0x259   : > { %v1242_v0 = vpop.permute.xlu1 %1241  ;;  %2335 = vmatprep.mubr.msk.f32.mxu1 %vm1502_vm12, %v1486_v39  ;;  %v1454_v29 = vsel %vm1439_vm9, %v3852_v41, %v1240_v27 }
 0x25a   : > { %2336 = vmatmul.mubr.msk.f32.gmra.mxu1 %vm1502_vm12, %v1487_v8  ;;  %v1455_v15 = vsel %vm1439_vm9, %v1438_v33, %v1242_v0 }
 0x25c   : > { %v1288_v4 = vpop.permute.xlu0 %1287 }
 0x25d   : > { %v1290_v30 = vpop.permute.xlu1 %1289  ;;  %v1471_v59 = vsel %vm1456_vm10, %v1454_v29, %v1288_v4 }
 0x25e   : > { %v1472_v54 = vsel %vm1456_vm10, %v1455_v15, %v1290_v30 }
 0x260   : > { %v1336_v35 = vpop.permute.xlu0 %1335 }
 0x261   : > { %v1338_v1 = vpop.permute.xlu1 %1337  ;;  %v1488_v44 = vsel %vm1473_vm11, %v1471_v59, %v1336_v35 }
 0x262   : > { %v1489_v26 = vsel %vm1473_vm11, %v1472_v54, %v1338_v1  ;;  %2338 = vmatprep.mubr.msk.f32.mxu1 %vm1502_vm12, %v1488_v44 }
 0x263   : > { %2339 = vmatmul.mubr.msk.f32.gmra.mxu1 %vm1502_vm12, %v1489_v26 }
 0x264   : > { %v583_v20 = vpop.permute.xlu0 %582 }
 0x265   : > { %v586_v11 = vadd.f32 %v3853_v3, %v583_v20  ;;  %v585_v24 = vadd.f32 %v583_v20, %v3854_v37  ;;  %v588_v18 = vadd.f32 %v3855_v46, %v583_v20  ;;  %v587_v21 = vadd.f32 %v583_v20, %v3856_v13 }
 0x266   : > { %v590_v40 = vadd.f32 %v3857_v22, %v583_v20  ;;  %v589_v10 = vadd.f32 %v583_v20, %v3858_v12  ;;  %v592_v43 = vadd.f32 %v3859_v34, %v583_v20  ;;  %v591_v36 = vadd.f32 %v583_v20, %v3860_v58 }
 0x267   : > { %1937 = vrot.lane.b32.xlu0 %v586_v11, %s2554_s17  ;;  %1935 = vrot.lane.b32.xlu1 %v585_v24, %s2554_s17  ;;  %v594_v31 = vadd.f32 %v3861_v2, %v583_v20  ;;  %v593_v45 = vadd.f32 %v583_v20, %v3862_v23  ;;  %v596_v53 = vadd.f32 %v3863_v9, %v583_v20 }
 0x268   : > { %v595_v42 = vadd.f32 %v583_v20, %v3864_v19  ;;  %v598_v28 = vadd.f32 %v3865_v25, %v583_v20  ;;  %v597_v50 = vadd.f32 %v583_v20, %v3866_v63  ;;  %v600_v48 = vadd.f32 %v3867_v6, %v583_v20 }
 0x269   : > { %v599_v55 = vadd.f32 %v583_v20, %v3868_v61 }
 0x26b   : > { %1941 = vrot.lane.b32.xlu0 %v588_v18, %s2554_s17  ;;  %1939 = vrot.lane.b32.xlu1 %v587_v21, %s2554_s17 }
 0x26f   : > { %1945 = vrot.lane.b32.xlu0 %v590_v40, %s2554_s17  ;;  %1943 = vrot.lane.b32.xlu1 %v589_v10, %s2554_s17 }
 0x273   : > { %1949 = vrot.lane.b32.xlu0 %v592_v43, %s2554_s17  ;;  %1947 = vrot.lane.b32.xlu1 %v591_v36, %s2554_s17 }
 0x277   : > { %1953 = vrot.lane.b32.xlu0 %v594_v31, %s2554_s17  ;;  %1951 = vrot.lane.b32.xlu1 %v593_v45, %s2554_s17  ;;  %v3607_v31 = vld [vmem:[%s3731_s6] ss:$0 sm:$0xff] }
 0x27b   : > { %1957 = vrot.lane.b32.xlu0 %v596_v53, %s2554_s17  ;;  %1955 = vrot.lane.b32.xlu1 %v595_v42, %s2554_s17 }
 0x27f   : > { %1961 = vrot.lane.b32.xlu0 %v598_v28, %s2554_s17  ;;  %1959 = vrot.lane.b32.xlu1 %v597_v50, %s2554_s17 }
 0x283   : > { %1965 = vrot.lane.b32.xlu0 %v600_v48, %s2554_s17  ;;  %1963 = vrot.lane.b32.xlu1 %v599_v55, %s2554_s17  ;;  %s2212_s17 = sshll.u32 %s2527_s30, 4 }
 0x284   : > { %s2045_s22 = sadd.s32 %s2212_s17, %s2206_s25  ;;  %s3673_s17 = scalar_lea.sflag [#allocation4], %s310_s13 }
 0x285   : > { %s2207_s14 = sshll.u32 %s2045_s22, 7  ;;  %s2451_s25 = scalar_lea.vmem %s3660_s21, 2048 }
 0x286   : > { %s3667_s24 = scalar_lea.hbm %s3733_s8, %s2207_s14  ;;  %p2452_p4 = scmp.ne.s32.totalorder %s3660_s21, %s2451_s25 }
 0x287   : > { %s2555_s22 = smov [#allocation3]  }
 0x288   : > { %p2453_p5 = pnand %p2452_p4, %p2653_p3  ;;  %s2455_s20 = sshll.u32 %s2555_s22, 4  ;;  %s2456_s20 = int_to_ptr.vmem [resolvable:$false] %s2455_s20 }
 0x289   : > { %s2457_s0 = scalar_lea.vmem %s2456_s20, 4096  ;;  %p2458_p7 = scmp.lt.s32.totalorder %s3660_s21, %s2456_s20 }
 0x28a   : > { %p2454_p6 = pneg %p2453_p5  ;;  %p2459_p9 = scmp.lt.s32.totalorder %s2457_s0, %s2451_s25 }
 0x28c   : > { %p2460_p10 = por %p2459_p9, %p2458_p7 }
 0x28e   : > { %p2461_p11 = pnand %p2460_p10, %p2454_p6 }
 0x2c6   : > { %v2319_v60 = vpop.f32.mrf.mxu1 }
 0x2c7   : > { %v1626_v5 = vadd.f32 %v2319_v60, %v2167_v17 }
 0x2c8   : > { %v1620_v47 = vpop.f32.mrf.mxu1 }
 0x2c9   : > { %v1621_v39 = vadd.f32 %v2167_v17, %v1620_v47  ;;  %v1700_v62 = vmax.f32 %v1626_v5, 0.0 }
 0x2ca   : > { %v2322_v14 = vpop.f32.mrf.mxu1 }
 0x2cb   : > { %v1699_v32 = vmax.f32 %v1621_v39, 0.0  ;;  %v1636_v51 = vadd.f32 %v2322_v14, %v2167_v17 }
 0x2cc   : > { %v1630_v56 = vpop.f32.mrf.mxu1 }
 0x2cd   : > { %v1631_v27 = vadd.f32 %v2167_v17, %v1630_v56  ;;  %2343 = vmatprep.mubr.msk.f32.mxu0 %vm339_vm1, %v1699_v32  ;;  %v1702_v57 = vmax.f32 %v1636_v51, 0.0 }
 0x2ce   : > { %2344 = vmatmul.mubr.msk.f32.vlgmr.msra.gmra.mxu0 %vm339_vm1, %v1700_v62 }
 0x2cf   : > { %v1701_v0 = vmax.f32 %v1631_v27, 0.0 }
 0x2d1   : > { %2346 = vmatprep.mubr.msk.f32.mxu0 %vm339_vm1, %v1701_v0 }
 0x2d2   : > { %2347 = vmatmul.mubr.msk.f32.gmra.mxu0 %vm339_vm1, %v1702_v57 }
 0x2d4   : > { %v2325_v52 = vpop.f32.mrf.mxu1 }
 0x2d5   : > { %v1646_v8 = vadd.f32 %v2325_v52, %v2167_v17 }
 0x2d6   : > { %v1640_v38 = vpop.f32.mrf.mxu1 }
 0x2d7   : > { %v1641_v7 = vadd.f32 %v2167_v17, %v1640_v38  ;;  %v1704_v30 = vmax.f32 %v1646_v8, 0.0 }
 0x2d9   : > { %v1703_v4 = vmax.f32 %v1641_v7, 0.0  ;;  %v1938_v23 = vpop.permute.xlu0 %1937  ;;  %v1936_v53 = vpop.permute.xlu1 %1935 }
 0x2db   : > { %2349 = vmatprep.mubr.msk.f32.mxu0 %vm339_vm1, %v1703_v4 }
 0x2dc   : > { %2350 = vmatmul.mubr.msk.f32.gmra.mxu0 %vm339_vm1, %v1704_v30 }
 0x2dd   : > { %v1942_v48 = vpop.permute.xlu0 %1941  ;;  %v1940_v5 = vpop.permute.xlu1 %1939 }
 0x2e1   : > { %v1946_v51 = vpop.permute.xlu0 %1945  ;;  %v1944_v57 = vpop.permute.xlu1 %1943 }
 0x2e5   : > { %v1950_v30 = vpop.permute.xlu0 %1949 }
 0x2f4   : > { %v2328_v16 = vpop.f32.mrf.mxu1 }
 0x2f5   : > { %v1656_v49 = vadd.f32 %v2328_v16, %v2167_v17 }
 0x2f6   : > { %v1650_v33 = vpop.f32.mrf.mxu1 }
 0x2f7   : > { %v1651_v41 = vadd.f32 %v2167_v17, %v1650_v33  ;;  %v1706_v15 = vmax.f32 %v1656_v49, 0.0 }
 0x2f9   : > { %v1705_v29 = vmax.f32 %v1651_v41, 0.0  ;;  %v1948_v41 = vpop.permute.xlu1 %1947 }
 0x2fb   : > { %2352 = vmatprep.mubr.msk.f32.mxu0 %vm339_vm1, %v1705_v29 }
 0x2fc   : > { %2353 = vmatmul.mubr.msk.f32.gmra.mxu0 %vm339_vm1, %v1706_v15 }
 0x310   : > { %v2331_v59 = vpop.f32.mrf.mxu1 }
 0x311   : > { %v1666_v54 = vadd.f32 %v2331_v59, %v2167_v17 }
 0x312   : > { %v1660_v35 = vpop.f32.mrf.mxu1 }
 0x313   : > { %v1661_v1 = vadd.f32 %v2167_v17, %v1660_v35  ;;  %v1708_v26 = vmax.f32 %v1666_v54, 0.0  ;;  %v1954_v35 = vpop.permute.xlu0 %1953 }
 0x315   : > { %v1707_v44 = vmax.f32 %v1661_v1, 0.0 }
 0x316   : > { %v2334_v20 = vpop.f32.mrf.mxu1 }
 0x317   : > { %2355 = vmatprep.mubr.msk.f32.mxu0 %vm339_vm1, %v1707_v44  ;;  %v1676_v3 = vadd.f32 %v2334_v20, %v2167_v17 }
 0x318   : > { %2356 = vmatmul.mubr.msk.f32.gmra.mxu0 %vm339_vm1, %v1708_v26  ;;  %v1670_v11 = vpop.f32.mrf.mxu1  ;;  %v1952_v26 = vpop.permute.xlu1 %1951 }
 0x319   : > { %v1671_v37 = vadd.f32 %v2167_v17, %v1670_v11  ;;  %v1710_v18 = vmax.f32 %v1676_v3, 0.0 }
 0x31a   : > { %v2337_v24 = vpop.f32.mrf.mxu1 }
 0x31b   : > { %v1709_v46 = vmax.f32 %v1671_v37, 0.0  ;;  %v1686_v13 = vadd.f32 %v2337_v24, %v2167_v17  ;;  %v1958_v24 = vpop.permute.xlu0 %1957 }
 0x31c   : > { %v1680_v21 = vpop.f32.mrf.mxu1 }
 0x31d   : > { %v1681_v22 = vadd.f32 %v2167_v17, %v1680_v21  ;;  %2358 = vmatprep.mubr.msk.f32.mxu0 %vm339_vm1, %v1709_v46  ;;  %v1712_v12 = vmax.f32 %v1686_v13, 0.0  ;;  %v1956_v21 = vpop.permute.xlu1 %1955 }
 0x31e   : > { %2359 = vmatmul.mubr.msk.f32.gmra.mxu0 %vm339_vm1, %v1710_v18 }
 0x31f   : > { %v1711_v40 = vmax.f32 %v1681_v22, 0.0 }
 0x321   : > { %2361 = vmatprep.mubr.msk.f32.mxu0 %vm339_vm1, %v1711_v40 }
 0x322   : > { %2362 = vmatmul.mubr.msk.f32.gmra.mxu0 %vm339_vm1, %v1712_v12 }
 0x323   : > { %v2340_v10 = vpop.f32.mrf.mxu1 }
 0x324   : > { %v1696_v34 = vadd.f32 %v2340_v10, %v2167_v17 }
 0x325   : > { %v1690_v43 = vpop.f32.mrf.mxu1 }
 0x326   : > { %v1691_v58 = vadd.f32 %v2167_v17, %v1690_v43  ;;  %v1714_v2 = vmax.f32 %v1696_v34, 0.0 }
 0x328   : > { %v1713_v36 = vmax.f32 %v1691_v58, 0.0 }
 0x32a   : > { %2364 = vmatprep.mubr.msk.f32.mxu0 %vm339_vm1, %v1713_v36  ;;  %v1962_v36 = vpop.permute.xlu0 %1961 }
 0x32b   : > { %2365 = vmatmul.mubr.msk.f32.gmra.mxu0 %vm339_vm1, %v1714_v2 }
 0x38e   : > { %v2345_v45 = vpop.f32.mrf.mxu0 }
 0x38f   : > { %v1846_v9 = vadd.f32 %v2345_v45, %v3607_v31 }
 0x390   : > { %v1840_v19 = vpop.f32.mrf.mxu0 }
 0x391   : > { %v1984_v42 = vadd.f32 %v1938_v23, %v1846_v9  ;;  %v1841_v25 = vadd.f32 %v3607_v31, %v1840_v19 }
 0x392   : > { %v2348_v28 = vpop.f32.mrf.mxu0 }
 0x393   : > { %v2000_v63 = vmax.f32 %v1984_v42, 0.0  ;;  %v1983_v50 = vadd.f32 %v1936_v53, %v1841_v25  ;;  %v1856_v6 = vadd.f32 %v2348_v28, %v3607_v31  ;;  %v1960_v53 = vpop.permute.xlu1 %1959 }
 0x394   : > { %v1850_v61 = vpop.f32.mrf.mxu0 }
 0x395   : > { %2016 = vst.msk [vmem:[%s3614_s26 + $0x8] sm:$0xff] %vm1405_vm7, %v2000_v63  ;;  %v1999_v55 = vmax.f32 %v1983_v50, 0.0  ;;  %v1986_v17 = vadd.f32 %v1942_v48, %v1856_v6  ;;  %v1851_v60 = vadd.f32 %v3607_v31, %v1850_v61  ;;  %v1966_v50 = vpop.permute.xlu0 %1965 }
 0x397   : > { %2015 = vst.msk [vmem:[%s3614_s26] sm:$0xff] %vm1405_vm7, %v1999_v55  ;;  %v2002_v47 = vmax.f32 %v1986_v17, 0.0  ;;  %v1985_v39 = vadd.f32 %v1940_v5, %v1851_v60  ;;  %v1964_v55 = vpop.permute.xlu1 %1963 }
 0x399   : > { %2018 = vst.msk [vmem:[%s3614_s26 + $0x18] sm:$0xff] %vm1405_vm7, %v2002_v47  ;;  %v2001_v14 = vmax.f32 %v1985_v39, 0.0 }
 0x39b   : > { %2017 = vst.msk [vmem:[%s3614_s26 + $0x10] sm:$0xff] %vm1405_vm7, %v2001_v14 }
 0x39c   : > { %v2351_v32 = vpop.f32.mrf.mxu0 }
 0x39d   : > { %v1866_v62 = vadd.f32 %v2351_v32, %v3607_v31 }
 0x39e   : > { %v1860_v56 = vpop.f32.mrf.mxu0 }
 0x39f   : > { %v1988_v27 = vadd.f32 %v1946_v51, %v1866_v62  ;;  %v1861_v0 = vadd.f32 %v3607_v31, %v1860_v56 }
 0x3a1   : > { %v2004_v52 = vmax.f32 %v1988_v27, 0.0  ;;  %v1987_v8 = vadd.f32 %v1944_v57, %v1861_v0 }
 0x3a3   : > { %2020 = vst.msk [vmem:[%s3614_s26 + $0x28] sm:$0xff] %vm1405_vm7, %v2004_v52  ;;  %v2003_v38 = vmax.f32 %v1987_v8, 0.0 }
 0x3a5   : > { %2019 = vst.msk [vmem:[%s3614_s26 + $0x20] sm:$0xff] %vm1405_vm7, %v2003_v38 }
 0x3bc   : > { %v2354_v7 = vpop.f32.mrf.mxu0 }
 0x3bd   : > { %v1876_v4 = vadd.f32 %v2354_v7, %v3607_v31 }
 0x3be   : > { %v1870_v16 = vpop.f32.mrf.mxu0 }
 0x3bf   : > { %v1990_v49 = vadd.f32 %v1950_v30, %v1876_v4  ;;  %v1871_v33 = vadd.f32 %v3607_v31, %v1870_v16 }
 0x3c1   : > { %v2006_v29 = vmax.f32 %v1990_v49, 0.0  ;;  %v1989_v15 = vadd.f32 %v1948_v41, %v1871_v33 }
 0x3c3   : > { %2022 = vst.msk [vmem:[%s3614_s26 + $0x38] sm:$0xff] %vm1405_vm7, %v2006_v29  ;;  %v2005_v59 = vmax.f32 %v1989_v15, 0.0 }
 0x3c5   : > { %2021 = vst.msk [vmem:[%s3614_s26 + $0x30] sm:$0xff] %vm1405_vm7, %v2005_v59 }
 0x3d8   : > { %v2357_v54 = vpop.f32.mrf.mxu0 }
 0x3d9   : > { %v1886_v1 = vadd.f32 %v2357_v54, %v3607_v31 }
 0x3da   : > { %v1880_v44 = vpop.f32.mrf.mxu0 }
 0x3db   : > { %v1992_v20 = vadd.f32 %v1954_v35, %v1886_v1  ;;  %v1881_v3 = vadd.f32 %v3607_v31, %v1880_v44 }
 0x3dd   : > { %v2008_v11 = vmax.f32 %v1992_v20, 0.0  ;;  %v1991_v37 = vadd.f32 %v1952_v26, %v1881_v3 }
 0x3de   : > { %v2360_v18 = vpop.f32.mrf.mxu0 }
 0x3df   : > { %2024 = vst.msk [vmem:[%s3614_s26 + $0x48] sm:$0xff] %vm1405_vm7, %v2008_v11  ;;  %v2007_v46 = vmax.f32 %v1991_v37, 0.0  ;;  %v1896_v13 = vadd.f32 %v2360_v18, %v3607_v31 }
 0x3e0   : > { %v1890_v22 = vpop.f32.mrf.mxu0 }
 0x3e1   : > { %2023 = vst.msk [vmem:[%s3614_s26 + $0x40] sm:$0xff] %vm1405_vm7, %v2007_v46  ;;  %v1994_v40 = vadd.f32 %v1958_v24, %v1896_v13  ;;  %v1891_v12 = vadd.f32 %v3607_v31, %v1890_v22 }
 0x3e2   : > { %v2363_v10 = vpop.f32.mrf.mxu0 }
 0x3e3   : > { %v2010_v34 = vmax.f32 %v1994_v40, 0.0  ;;  %v1993_v43 = vadd.f32 %v1956_v21, %v1891_v12  ;;  %v1906_v58 = vadd.f32 %v2363_v10, %v3607_v31 }
 0x3e4   : > { %v1900_v2 = vpop.f32.mrf.mxu0 }
 0x3e5   : > { %2026 = vst.msk [vmem:[%s3614_s26 + $0x58] sm:$0xff] %vm1405_vm7, %v2010_v34  ;;  %v2009_v23 = vmax.f32 %v1993_v43, 0.0  ;;  %v1996_v45 = vadd.f32 %v1962_v36, %v1906_v58  ;;  %v1901_v9 = vadd.f32 %v3607_v31, %v1900_v2 }
 0x3e7   : > { %2025 = vst.msk [vmem:[%s3614_s26 + $0x50] sm:$0xff] %vm1405_vm7, %v2009_v23  ;;  %v2012_v19 = vmax.f32 %v1996_v45, 0.0  ;;  %v1995_v42 = vadd.f32 %v1960_v53, %v1901_v9 }
 0x3e9   : > { %2028 = vst.msk [vmem:[%s3614_s26 + $0x68] sm:$0xff] %vm1405_vm7, %v2012_v19  ;;  %v2011_v25 = vmax.f32 %v1995_v42, 0.0 }
 0x3eb   : > { %2027 = vst.msk [vmem:[%s3614_s26 + $0x60] sm:$0xff] %vm1405_vm7, %v2011_v25  ;;  %v2366_v28 = vpop.f32.mrf.mxu0 }
 0x3ec   : > { %v1916_v63 = vadd.f32 %v2366_v28, %v3607_v31 }
 0x3ed   : > { %v1910_v6 = vpop.f32.mrf.mxu0 }
 0x3ee   : > { %v1998_v48 = vadd.f32 %v1966_v50, %v1916_v63  ;;  %v1911_v61 = vadd.f32 %v3607_v31, %v1910_v6 }
 0x3f0   : > { %v2014_v17 = vmax.f32 %v1998_v48, 0.0  ;;  %v1997_v60 = vadd.f32 %v1964_v55, %v1911_v61 }
 0x3f2   : > { %2030 = vst.msk [vmem:[%s3614_s26 + $0x78] sm:$0xff] %vm1405_vm7, %v2014_v17  ;;  %v2013_v5 = vmax.f32 %v1997_v60, 0.0 }
 0x3f4   : > { %2029 = vst.msk [vmem:[%s3614_s26 + $0x70] sm:$0xff] %vm1405_vm7, %v2013_v5 }
 0x3f5   : > { %2464 = shalt.err (!%p2461_p11)
}
 0x3f6   : > { %s2465_s13 = scalar_lea.hbm %s3667_s24, 2048  ;;  %s2469_s30 = scalar_lea.hbm %s3733_s8, 8192 }
 0x3f7   : > { %p2466_p12 = scmp.ne.s32.totalorder %s3667_s24, %s2465_s13  ;;  %p2470_p1 = scmp.lt.s32.totalorder %s3667_s24, %s3733_s8 }
 0x3f8   : > { %p2471_p2 = scmp.lt.s32.totalorder %s2469_s30, %s2465_s13 }
 0x3f9   : > { %p2467_p13 = pnand %p2466_p12, %p2653_p3 }
 0x3fa   : > { %p2472_p4 = por %p2471_p2, %p2470_p1 }
 0x3fb   : > { %p2468_p0 = pneg %p2467_p13 }
 0x3fd   : > { %p2473_p5 = pnand %p2472_p4, %p2468_p0 }
 0x3ff   : > { %2476 = shalt.err (!%p2473_p5)
}
 0x400   : > { %s2556_s0 = smov 128   ;;  %s3869_s20 = smov 8  }
 0x401   : > { %2369 = dma.vmem_to_hbm [thread:$0]  (%p2653_p3), %s3660_s21, 2048, %s3667_s24, %s3673_s17, %s2556_s0, %s2556_s0, %s3869_s20  }
 0x402 PF: > { %p2375_p6 = scmp.ge.s32.totalorder %s2543_s12, 2  ;;  %s2063_s25 = sand.u32 1, %s2515_s27  }
 0x403   : > { %s2064_s13 = scalar_lea.sflag [#allocation4], %s2063_s25 }
 0x404   : > { %p2372_p7 = pnand %p2375_p6, %p2662_p8 }
 0x406   : > { %p2373_p9 = pneg %p2372_p7 }
 0x408   : > { %2510 = dma.done.wait (%p2373_p9), %s2064_s13, 2048  }
 0x409   : > { %2512 = vsyncadd (%p2373_p9), %s2064_s13, 4294965248  ;;  %s21_s12 = sadd.s32 1, %s2543_s12   ;;  %s3870_s27 = smov %s2519_s28 }
 0x40a   : > { %p18_p10 = scmp.ge.s32.totalorder %s21_s12, 6   ;;  %s3871_s28 = smov %s2523_s29 }
 0x40b   : > { %s3872_s29 = smov %s2671_s23  ;;  %s3873_s30 = smov %s2535_s10 }
 0x40c   : > { %s3874_s9 = smov %s2539_s11  ;;  %s3875_s10 = smov %s3878_s15 }
 0x40d   : > { %s3876_s11 = smov %s3882_s16  ;;  %20 = sbr.rel (!%p18_p10) target bundleno = 7 (0x7), region = 92 }
 0x412   :  { %2069 = vsyncpa [#allocation4], 1 }
 0x413   :  { %2071 = vsyncpa [#allocation4 + $0x1], 1 }

</bundles_post_ra>
